<compile_context>
chip_gen: v7x
topology: tpu7x:2x2x1
jax: 0.10.0
libtpu: 0.0.40
codegen_flags: <defaults>
</compile_context>

<pallas_src>
import functools

import jax
import jax.numpy as jnp
import numpy as np
from jax.experimental import pallas as pl
from jax.experimental.pallas import tpu as pltpu


def _flash_self_attention_kernel(gamma_ref, xq_ref, xk_ref, wq_ref, bq_ref,
                                 wvk_ref, bvk_ref, o_ref,
                                 qT_ref, m_ref, l_ref, acc_ref, *rest,
                                 c, cache_kv):
    """One grid step = (batch b, query tile qi, key tile ki); ki is the reduction axis."""
    qi = pl.program_id(1)
    ki = pl.program_id(2)

    @pl.when(ki == 0)
    def _init():
        # Query projection once per (b, qi). The softmax scale is pre-folded into wq/bq,
        # so no (tq, tk) VPU scaling pass is needed later. One small XLU transpose per
        # query tile, amortized over all key tiles.
        x_qT = jnp.transpose(xq_ref[0].astype(jnp.float32))            # (tq, C)
        q = jnp.dot(x_qT.astype(jnp.bfloat16), wq_ref[...],
                    preferred_element_type=jnp.float32) + bq_ref[...]  # (tq, Cq)
        qT_ref[...] = q.astype(qT_ref.dtype)
        m_ref[...] = jnp.full_like(m_ref, -jnp.inf)
        l_ref[...] = jnp.zeros_like(l_ref)
        acc_ref[...] = jnp.zeros_like(acc_ref)

    if cache_kv:
        (kv_ref,) = rest

        # Fused value|key projection for this key tile, computed only while processing
        # the first query tile of each batch, then cached in VMEM for all later qi.
        @pl.when(qi == 0)
        def _project_kv():
            vk = jnp.dot(wvk_ref[...], xk_ref[0],
                         preferred_element_type=jnp.float32) + bvk_ref[...]
            kv_ref[ki] = vk.astype(kv_ref.dtype)

        vk_t = kv_ref[ki]                                              # (C+Cq, tk) bf16
        v = vk_t[:c, :]                                                # (C,  tk)
        k = vk_t[c:, :]                                                # (Cq, tk)
    else:
        # Recompute the projection per (qi, ki): resolution-independent fallback.
        vk = jnp.dot(wvk_ref[...], xk_ref[0],
                     preferred_element_type=jnp.float32) + bvk_ref[...]
        v = vk[:c, :].astype(jnp.bfloat16)
        k = vk[c:, :].astype(jnp.bfloat16)

    # Scores: (tq, Cq) @ (Cq, tk) -> (tq, tk). k is already (Cq, tk): no k.T needed.
    s = jnp.dot(qT_ref[...], k, preferred_element_type=jnp.float32)

    # Online (flash) softmax over the key axis, f32 statistics.
    m_prev = m_ref[...]
    m_new = jnp.maximum(m_prev, jnp.max(s, axis=-1, keepdims=True))    # (tq, 1)
    alpha = jnp.exp(m_prev - m_new)
    p = jnp.exp(s - m_new)                                             # (tq, tk)
    l_ref[...] = alpha * l_ref[...] + jnp.sum(p, axis=-1, keepdims=True)
    # acc += p @ v^T: contract the key axis of both operands (trans-B dot_general),
    # so v is never materialized transposed.
    pv = jax.lax.dot_general(p.astype(jnp.bfloat16), v,
                             dimension_numbers=(((1,), (1,)), ((), ())),
                             preferred_element_type=jnp.float32)       # (tq, C)
    acc_ref[...] = alpha * acc_ref[...] + pv
    m_ref[...] = m_new

    @pl.when(ki == pl.num_programs(2) - 1)
    def _finalize():
        out_t = acc_ref[...] * pl.reciprocal(l_ref[...], approx=True)  # (tq, C), EUP rcp
        gamma = gamma_ref[0, 0]
        # Back to channel-major (C, tq), add the residual; lane-dense store on tokens.
        o_ref[0] = (gamma * jnp.transpose(out_t)
                    + xq_ref[0].astype(jnp.float32)).astype(o_ref.dtype)


def _largest_divisor_leq(n, cap):
    d = min(cap, n)
    while n % d:
        d -= 1
    return d


def self_attention(x_nchw, wq, bq, wk, bk, wv, bv, gamma, *, tq=256, tk=512,
                   cache_kv=None, kv_cache_budget_bytes=16 * 1024 * 1024):
    """SAGAN SelfAttention forward.

    x_nchw: (B, C, H, W) f32. Weights are stored channels-last (= torch Conv2d 1x1 weight
    transposed): wq/wk: (C, C//8), wv: (C, C); biases (1, C//8)/(1, C); gamma: (1, 1).
    """
    B, C, H, W = x_nchw.shape
    N = H * W
    Cq = C // 8
    scale = float(Cq) ** -0.5

    # Default tiles sized for the v7x 64 MiB VMEM budget (also fit v5e/v6e defaults).
    tq = _largest_divisor_leq(N, tq)
    tk = _largest_divisor_leq(N, tk)
    nq, nk = N // tq, N // tk

    if cache_kv is None:
        cache_kv = (C + Cq) * N * 2 <= kv_cache_budget_bytes

    # Free reshape (no HBM transpose pass): NCHW -> (B, C, N); bf16 halves DMA bytes.
    x = x_nchw.reshape(B, C, N).astype(jnp.bfloat16)

    # Fold the softmax scale into the query projection (trace-time, free).
    wq_s = (wq * scale).astype(jnp.bfloat16)                            # (C, Cq)
    bq_s = (bq * scale).astype(jnp.float32)                             # (1, Cq)
    # Fuse value|key projections into a single channel-major weight: (C + Cq, C).
    wvk = jnp.concatenate([wv, wk], axis=1).T.astype(jnp.bfloat16)
    bvk = jnp.concatenate([bv, bk], axis=1).reshape(C + Cq, 1).astype(jnp.float32)

    if cache_kv:
        # x key tiles are only consumed while filling the VMEM K/V cache (qi == 0); for
        # qi > 0 the index map pins block 0, so the block index is unchanged across the
        # whole ki loop and Pallas skips the redundant HBM DMAs.
        xk_index_map = lambda b, qi, ki: (b, 0, jnp.where(qi == 0, ki, 0))
        # The cache is filled on qi == 0 only, so the qi axis must stay sequential
        # (per-core scratch); the batch axis still gives megacore parallelism.
        dim_sems = ("parallel", "arbitrary", "arbitrary")
    else:
        xk_index_map = lambda b, qi, ki: (b, 0, ki)
        dim_sems = ("parallel", "parallel", "arbitrary")

    scratch_shapes = [
        pltpu.VMEM((tq, Cq), jnp.bfloat16),   # q tile (token-major)
        pltpu.VMEM((tq, 1), jnp.float32),     # running max
        pltpu.VMEM((tq, 1), jnp.float32),     # running softmax denominator
        pltpu.VMEM((tq, C), jnp.float32),     # output accumulator
    ]
    if cache_kv:
        scratch_shapes.append(pltpu.VMEM((nk, C + Cq, tk), jnp.bfloat16))  # K/V cache

    kernel = functools.partial(_flash_self_attention_kernel, c=C, cache_kv=cache_kv)
    grid = (B, nq, nk)                                                  # reduction axis last

    out = pl.pallas_call(
        kernel,
        out_shape=jax.ShapeDtypeStruct((B, C, N), jnp.float32),
        grid_spec=pltpu.PrefetchScalarGridSpec(
            num_scalar_prefetch=0,
            grid=grid,
            in_specs=[
                pl.BlockSpec(memory_space=pltpu.SMEM),                    # gamma (1, 1)
                pl.BlockSpec((1, C, tq), lambda b, qi, ki: (b, 0, qi)),   # x, query tile
                pl.BlockSpec((1, C, tk), xk_index_map),                   # x, key tile
                pl.BlockSpec((C, Cq), lambda b, qi, ki: (0, 0)),          # wq (scaled)
                pl.BlockSpec((1, Cq), lambda b, qi, ki: (0, 0)),          # bq (scaled)
                pl.BlockSpec((C + Cq, C), lambda b, qi, ki: (0, 0)),      # [wv; wk]^T
                pl.BlockSpec((C + Cq, 1), lambda b, qi, ki: (0, 0)),      # [bv; bk]
            ],
            out_specs=pl.BlockSpec((1, C, tq), lambda b, qi, ki: (b, 0, qi)),
            scratch_shapes=scratch_shapes,
        ),
        compiler_params=pltpu.CompilerParams(
            dimension_semantics=dim_sems,
            vmem_limit_bytes=48 * 1024 * 1024,
        ),
    )(gamma, x, x, wq_s, bq_s, wvk, bvk)

    return out.reshape(B, C, H, W)


def self_attention_ref(x_nchw, wq, bq, wk, bk, wv, bv, gamma):
    """Pure-JAX f32 reference mirroring the PyTorch forward (including the scale)."""
    B, C, H, W = x_nchw.shape
    N = H * W
    Cq = C // 8
    scale = float(Cq) ** -0.5
    xt = jnp.transpose(x_nchw.reshape(B, C, N), (0, 2, 1))             # (B, N, C)
    q = xt @ wq + bq                                                   # (B, N, Cq)
    k = xt @ wk + bk                                                   # (B, N, Cq)
    v = xt @ wv + bv                                                   # (B, N, C)
    attn = jax.nn.softmax(jnp.einsum("bnc,bmc->bnm", q, k) * scale, axis=-1)
    out = jnp.einsum("bnm,bmc->bnc", attn, v)                          # (B, N, C)
    y = gamma[0, 0] * out + xt
    return jnp.transpose(y, (0, 2, 1)).reshape(B, C, H, W)


if __name__ == "__main__":
    B, C, H, W = 2, 32, 16, 16                 # in_channels=32 -> query/key channels = 4
    Cq = C // 8

    key = jax.random.PRNGKey(0)
    kx, kwq, kbq, kwk, kbk, kwv, kbv = jax.random.split(key, 7)

    x = jax.random.normal(kx, (B, C, H, W), dtype=jnp.float32)

    # Conv2d(kernel_size=1) weights, stored channels-last: (in, out). Deterministic init.
    wq = jax.random.normal(kwq, (C, Cq), dtype=jnp.float32) * 0.1
    bq = jax.random.normal(kbq, (1, Cq), dtype=jnp.float32) * 0.1
    wk = jax.random.normal(kwk, (C, Cq), dtype=jnp.float32) * 0.1
    bk = jax.random.normal(kbk, (1, Cq), dtype=jnp.float32) * 0.1
    wv = jax.random.normal(kwv, (C, C), dtype=jnp.float32) * 0.1
    bv = jax.random.normal(kbv, (1, C), dtype=jnp.float32) * 0.1
    # Module __init__ uses gamma = 0; use a deterministic nonzero value here so the
    # attention path actually contributes to the output under test.
    gamma = jnp.full((1, 1), 0.5, dtype=jnp.float32)

    y_ref = self_attention_ref(x, wq, bq, wk, bk, wv, bv, gamma)

    # tq=tk=128 with N=256 gives grid (2, 2, 2): exercises query tiling, the online
    # softmax accumulation across key tiles, and K/V cache reuse across query tiles.
    y = self_attention(x, wq, bq, wk, bk, wv, bv, gamma, tq=128, tk=128)
    y = jax.block_until_ready(y)
    # bf16 MXU inputs vs f32 reference -> loosened tolerance.
    np.testing.assert_allclose(np.asarray(y), np.asarray(y_ref), rtol=2e-2, atol=2e-2)

    # Also validate the recompute-per-tile fallback path (used when K/V would not fit VMEM).
    y_nc = self_attention(x, wq, bq, wk, bk, wv, bv, gamma, tq=128, tk=128,
                          cache_kv=False)
    y_nc = jax.block_until_ready(y_nc)
    np.testing.assert_allclose(np.asarray(y_nc), np.asarray(y_ref), rtol=2e-2, atol=2e-2)

    print("KERNEL_OK")
</pallas_src>

<mosaic_0001>
module attributes {stable_mosaic.version = 11 : i64} {
  func.func @_flash_self_attention_kernel(%arg0: i32, %arg1: i32, %arg2: i32, %arg3: memref<1x1xf32, #tpu.memory_space<smem>>, %arg4: memref<1x32x128xbf16, #tpu.memory_space<vmem>>, %arg5: memref<1x32x128xbf16, #tpu.memory_space<vmem>>, %arg6: memref<32x4xbf16, #tpu.memory_space<vmem>>, %arg7: memref<1x4xf32, #tpu.memory_space<vmem>>, %arg8: memref<36x32xbf16, #tpu.memory_space<vmem>>, %arg9: memref<36x1xf32, #tpu.memory_space<vmem>>, %arg10: memref<1x32x128xf32, #tpu.memory_space<vmem>>, %arg11: memref<128x4xbf16, #tpu.memory_space<vmem>>, %arg12: memref<128x1xf32, #tpu.memory_space<vmem>>, %arg13: memref<128x1xf32, #tpu.memory_space<vmem>>, %arg14: memref<128x32xf32, #tpu.memory_space<vmem>>, %arg15: memref<2x36x128xbf16, #tpu.memory_space<vmem>>) attributes {dimension_semantics = [#tpu.dimension_semantics<parallel>, #tpu.dimension_semantics<arbitrary>, #tpu.dimension_semantics<arbitrary>], iteration_bounds = array<i64: 2, 2, 2>, scalar_prefetch = 0 : i64, scratch_operands = 5 : i64, tpu.core_type = #tpu.core_type<tc>, window_params = [{transform_indices = @transform_0, window_bounds = array<i64: 1, 1>}, {transform_indices = @transform_1, window_bounds = array<i64: 1, 32, 128>}, {transform_indices = @transform_2, window_bounds = array<i64: 1, 32, 128>}, {pipeline_mode = #tpu.pipeline_mode<synchronous>, transform_indices = @transform_3, window_bounds = array<i64: 32, 4>}, {pipeline_mode = #tpu.pipeline_mode<synchronous>, transform_indices = @transform_4, window_bounds = array<i64: 1, 4>}, {pipeline_mode = #tpu.pipeline_mode<synchronous>, transform_indices = @transform_5, window_bounds = array<i64: 36, 32>}, {pipeline_mode = #tpu.pipeline_mode<synchronous>, transform_indices = @transform_6, window_bounds = array<i64: 36, 1>}, {transform_indices = @transform_7, window_bounds = array<i64: 1, 32, 128>}]} {
    %c0_i32 = arith.constant 0 : i32
    %0 = arith.cmpi eq, %arg2, %c0_i32 : i32
    %1 = arith.extui %0 : i1 to i32
    %c0_i32_0 = arith.constant 0 : i32
    %2 = arith.cmpi ne, %1, %c0_i32_0 : i32
    scf.if %2 {
      %c0_22 = arith.constant 0 : index
      %c0_23 = arith.constant 0 : index
      %c0_24 = arith.constant 0 : index
      %39 = vector.load %arg4[%c0_22, %c0_23, %c0_24] : memref<1x32x128xbf16, #tpu.memory_space<vmem>>, vector<1x32x128xbf16>
      %40 = vector.shape_cast %39 : vector<1x32x128xbf16> to vector<32x128xbf16>
      %41 = arith.extf %40 : vector<32x128xbf16> to vector<32x128xf32>
      %42 = tpu.transpose %41, [1, 0] : vector<32x128xf32> -> vector<128x32xf32>
      %43 = arith.truncf %42 : vector<128x32xf32> to vector<128x32xbf16>
      %c0_25 = arith.constant 0 : index
      %c0_26 = arith.constant 0 : index
      %44 = vector.load %arg6[%c0_25, %c0_26] : memref<32x4xbf16, #tpu.memory_space<vmem>>, vector<32x4xbf16>
      %cst_27 = arith.constant dense<0.000000e+00> : vector<128x4xf32>
      %45 = tpu.matmul %43, %44, %cst_27 {dimension_numbers = #tpu.dot_dimension_numbers<[1], [0], [0], [1], [0, 0, 1, 1], [], []>} : vector<128x32xbf16>, vector<32x4xbf16>, vector<128x4xf32> -> vector<128x4xf32>
      %c0_28 = arith.constant 0 : index
      %c0_29 = arith.constant 0 : index
      %46 = vector.load %arg7[%c0_28, %c0_29] : memref<1x4xf32, #tpu.memory_space<vmem>>, vector<1x4xf32>
      %47 = vector.broadcast %46 : vector<1x4xf32> to vector<128x4xf32>
      %48 = arith.addf %45, %47 : vector<128x4xf32>
      %49 = arith.truncf %48 : vector<128x4xf32> to vector<128x4xbf16>
      %c0_30 = arith.constant 0 : index
      %c0_31 = arith.constant 0 : index
      %50 = vector.load %arg11[%c0_30, %c0_31] : memref<128x4xbf16, #tpu.memory_space<vmem>>, vector<128x4xbf16>
      tpu.vector_store %arg11[%c0_30, %c0_31], %49 {strides = array<i32>} : memref<128x4xbf16, #tpu.memory_space<vmem>>, vector<128x4xbf16>,
      %cst_32 = arith.constant 0xFF800000 : f32
      %51 = vector.broadcast %cst_32 : f32 to vector<128x1xf32>
      %c0_33 = arith.constant 0 : index
      %c0_34 = arith.constant 0 : index
      %52 = vector.load %arg12[%c0_33, %c0_34] : memref<128x1xf32, #tpu.memory_space<vmem>>, vector<128x1xf32>
      tpu.vector_store %arg12[%c0_33, %c0_34], %51 {strides = array<i32>} : memref<128x1xf32, #tpu.memory_space<vmem>>, vector<128x1xf32>,
      %cst_35 = arith.constant 0.000000e+00 : f32
      %53 = vector.broadcast %cst_35 : f32 to vector<128x1xf32>
      %c0_36 = arith.constant 0 : index
      %c0_37 = arith.constant 0 : index
      %54 = vector.load %arg13[%c0_36, %c0_37] : memref<128x1xf32, #tpu.memory_space<vmem>>, vector<128x1xf32>
      tpu.vector_store %arg13[%c0_36, %c0_37], %53 {strides = array<i32>} : memref<128x1xf32, #tpu.memory_space<vmem>>, vector<128x1xf32>,
      %cst_38 = arith.constant 0.000000e+00 : f32
      %55 = vector.broadcast %cst_38 : f32 to vector<128x32xf32>
      %c0_39 = arith.constant 0 : index
      %c0_40 = arith.constant 0 : index
      %56 = vector.load %arg14[%c0_39, %c0_40] : memref<128x32xf32, #tpu.memory_space<vmem>>, vector<128x32xf32>
      tpu.vector_store %arg14[%c0_39, %c0_40], %55 {strides = array<i32>} : memref<128x32xf32, #tpu.memory_space<vmem>>, vector<128x32xf32>,
    } else {
    }
    %c0_i32_1 = arith.constant 0 : i32
    %3 = arith.cmpi eq, %arg1, %c0_i32_1 : i32
    %4 = arith.extui %3 : i1 to i32
    %c0_i32_2 = arith.constant 0 : i32
    %5 = arith.cmpi ne, %4, %c0_i32_2 : i32
    scf.if %5 {
      %c0_22 = arith.constant 0 : index
      %c0_23 = arith.constant 0 : index
      %39 = vector.load %arg8[%c0_22, %c0_23] : memref<36x32xbf16, #tpu.memory_space<vmem>>, vector<36x32xbf16>
      %c0_24 = arith.constant 0 : index
      %c0_25 = arith.constant 0 : index
      %c0_26 = arith.constant 0 : index
      %40 = vector.load %arg5[%c0_24, %c0_25, %c0_26] : memref<1x32x128xbf16, #tpu.memory_space<vmem>>, vector<1x32x128xbf16>
      %41 = vector.shape_cast %40 : vector<1x32x128xbf16> to vector<32x128xbf16>
      %cst_27 = arith.constant dense<0.000000e+00> : vector<36x128xf32>
      %42 = tpu.matmul %39, %41, %cst_27 {dimension_numbers = #tpu.dot_dimension_numbers<[1], [0], [0], [1], [0, 0, 1, 1], [], []>} : vector<36x32xbf16>, vector<32x128xbf16>, vector<36x128xf32> -> vector<36x128xf32>
      %c0_28 = arith.constant 0 : index
      %c0_29 = arith.constant 0 : index
      %43 = vector.load %arg9[%c0_28, %c0_29] : memref<36x1xf32, #tpu.memory_space<vmem>>, vector<36x1xf32>
      %44 = vector.broadcast %43 : vector<36x1xf32> to vector<36x128xf32>
      %45 = arith.addf %42, %44 : vector<36x128xf32>
      %46 = arith.truncf %45 : vector<36x128xf32> to vector<36x128xbf16>
      %47 = arith.index_cast %arg2 : i32 to index
      %c0_30 = arith.constant 0 : index
      %c0_31 = arith.constant 0 : index
      %48 = vector.load %arg15[%47, %c0_30, %c0_31] : memref<2x36x128xbf16, #tpu.memory_space<vmem>>, vector<1x36x128xbf16>
      %49 = vector.shape_cast %48 : vector<1x36x128xbf16> to vector<36x128xbf16>
      %50 = vector.shape_cast %46 : vector<36x128xbf16> to vector<1x36x128xbf16>
      tpu.vector_store %arg15[%47, %c0_30, %c0_31], %50 {strides = array<i32>} : memref<2x36x128xbf16, #tpu.memory_space<vmem>>, vector<1x36x128xbf16>,
    } else {
    }
    %6 = arith.index_cast %arg2 : i32 to index
    %c0 = arith.constant 0 : index
    %c0_3 = arith.constant 0 : index
    %7 = vector.load %arg15[%6, %c0, %c0_3] : memref<2x36x128xbf16, #tpu.memory_space<vmem>>, vector<1x36x128xbf16>
    %8 = vector.shape_cast %7 : vector<1x36x128xbf16> to vector<36x128xbf16>
    %9 = vector.extract_strided_slice %8 {offsets = [0, 0], sizes = [32, 128], strides = [1, 1]} : vector<36x128xbf16> to vector<32x128xbf16>
    %10 = vector.extract_strided_slice %8 {offsets = [32, 0], sizes = [4, 128], strides = [1, 1]} : vector<36x128xbf16> to vector<4x128xbf16>
    %c0_4 = arith.constant 0 : index
    %c0_5 = arith.constant 0 : index
    %11 = vector.load %arg11[%c0_4, %c0_5] : memref<128x4xbf16, #tpu.memory_space<vmem>>, vector<128x4xbf16>
    %cst = arith.constant dense<0.000000e+00> : vector<128x128xf32>
    %12 = tpu.matmul %11, %10, %cst {dimension_numbers = #tpu.dot_dimension_numbers<[1], [0], [0], [1], [0, 0, 1, 1], [], []>} : vector<128x4xbf16>, vector<4x128xbf16>, vector<128x128xf32> -> vector<128x128xf32>
    %c0_6 = arith.constant 0 : index
    %c0_7 = arith.constant 0 : index
    %13 = vector.load %arg12[%c0_6, %c0_7] : memref<128x1xf32, #tpu.memory_space<vmem>>, vector<128x1xf32>
    %cst_8 = arith.constant dense<0xFF800000> : vector<128xf32>
    %14 = vector.multi_reduction <maximumf>, %12, %cst_8 [1] : vector<128x128xf32> to vector<128xf32>
    %15 = vector.shape_cast %14 : vector<128xf32> to vector<128x1xf32>
    %16 = arith.maximumf %13, %15 : vector<128x1xf32>
    %17 = arith.subf %13, %16 : vector<128x1xf32>
    %18 = math.exp %17 : vector<128x1xf32>
    %19 = vector.broadcast %16 : vector<128x1xf32> to vector<128x128xf32>
    %20 = arith.subf %12, %19 : vector<128x128xf32>
    %21 = math.exp %20 : vector<128x128xf32>
    %c0_9 = arith.constant 0 : index
    %c0_10 = arith.constant 0 : index
    %22 = vector.load %arg13[%c0_9, %c0_10] : memref<128x1xf32, #tpu.memory_space<vmem>>, vector<128x1xf32>
    %23 = arith.mulf %18, %22 : vector<128x1xf32>
    %cst_11 = arith.constant dense<0.000000e+00> : vector<128xf32>
    %24 = vector.multi_reduction <add>, %21, %cst_11 [1] : vector<128x128xf32> to vector<128xf32>
    %25 = vector.shape_cast %24 : vector<128xf32> to vector<128x1xf32>
    %26 = arith.addf %23, %25 : vector<128x1xf32>
    %c0_12 = arith.constant 0 : index
    %c0_13 = arith.constant 0 : index
    %27 = vector.load %arg13[%c0_12, %c0_13] : memref<128x1xf32, #tpu.memory_space<vmem>>, vector<128x1xf32>
    tpu.vector_store %arg13[%c0_12, %c0_13], %26 {strides = array<i32>} : memref<128x1xf32, #tpu.memory_space<vmem>>, vector<128x1xf32>,
    %28 = arith.truncf %21 : vector<128x128xf32> to vector<128x128xbf16>
    %cst_14 = arith.constant dense<0.000000e+00> : vector<128x32xf32>
    %29 = tpu.matmul %28, %9, %cst_14 {dimension_numbers = #tpu.dot_dimension_numbers<[1], [1], [0], [0], [0, 0, 1, 0], [], []>} : vector<128x128xbf16>, vector<32x128xbf16>, vector<128x32xf32> -> vector<128x32xf32>
    %c0_15 = arith.constant 0 : index
    %c0_16 = arith.constant 0 : index
    %30 = vector.load %arg14[%c0_15, %c0_16] : memref<128x32xf32, #tpu.memory_space<vmem>>, vector<128x32xf32>
    %31 = vector.broadcast %18 : vector<128x1xf32> to vector<128x32xf32>
    %32 = arith.mulf %31, %30 : vector<128x32xf32>
    %33 = arith.addf %32, %29 : vector<128x32xf32>
    %c0_17 = arith.constant 0 : index
    %c0_18 = arith.constant 0 : index
    %34 = vector.load %arg14[%c0_17, %c0_18] : memref<128x32xf32, #tpu.memory_space<vmem>>, vector<128x32xf32>
    tpu.vector_store %arg14[%c0_17, %c0_18], %33 {strides = array<i32>} : memref<128x32xf32, #tpu.memory_space<vmem>>, vector<128x32xf32>,
    %c0_19 = arith.constant 0 : index
    %c0_20 = arith.constant 0 : index
    %35 = vector.load %arg12[%c0_19, %c0_20] : memref<128x1xf32, #tpu.memory_space<vmem>>, vector<128x1xf32>
    tpu.vector_store %arg12[%c0_19, %c0_20], %16 {strides = array<i32>} : memref<128x1xf32, #tpu.memory_space<vmem>>, vector<128x1xf32>,
    %c1_i32 = arith.constant 1 : i32
    %36 = arith.cmpi eq, %arg2, %c1_i32 : i32
    %37 = arith.extui %36 : i1 to i32
    %c0_i32_21 = arith.constant 0 : i32
    %38 = arith.cmpi ne, %37, %c0_i32_21 : i32
    scf.if %38 {
      %c0_22 = arith.constant 0 : index
      %c0_23 = arith.constant 0 : index
      %39 = vector.load %arg14[%c0_22, %c0_23] : memref<128x32xf32, #tpu.memory_space<vmem>>, vector<128x32xf32>
      %c0_24 = arith.constant 0 : index
      %c0_25 = arith.constant 0 : index
      %40 = vector.load %arg13[%c0_24, %c0_25] : memref<128x1xf32, #tpu.memory_space<vmem>>, vector<128x1xf32>
      %41 = tpu.reciprocal %40 {approx = true} : vector<128x1xf32> -> vector<128x1xf32>
      %42 = vector.broadcast %41 : vector<128x1xf32> to vector<128x32xf32>
      %43 = arith.mulf %39, %42 : vector<128x32xf32>
      %c0_26 = arith.constant 0 : index
      %c0_27 = arith.constant 0 : index
      %44 = memref.load %arg3[%c0_26, %c0_27] : memref<1x1xf32, #tpu.memory_space<smem>>
      %45 = tpu.transpose %43, [1, 0] : vector<128x32xf32> -> vector<32x128xf32>
      %46 = vector.broadcast %44 : f32 to vector<32x128xf32>
      %47 = arith.mulf %46, %45 : vector<32x128xf32>
      %c0_28 = arith.constant 0 : index
      %c0_29 = arith.constant 0 : index
      %c0_30 = arith.constant 0 : index
      %48 = vector.load %arg4[%c0_28, %c0_29, %c0_30] : memref<1x32x128xbf16, #tpu.memory_space<vmem>>, vector<1x32x128xbf16>
      %49 = vector.shape_cast %48 : vector<1x32x128xbf16> to vector<32x128xbf16>
      %50 = arith.extf %49 : vector<32x128xbf16> to vector<32x128xf32>
      %51 = arith.addf %47, %50 : vector<32x128xf32>
      %c0_31 = arith.constant 0 : index
      %c0_32 = arith.constant 0 : index
      %c0_33 = arith.constant 0 : index
      %52 = vector.load %arg10[%c0_31, %c0_32, %c0_33] : memref<1x32x128xf32, #tpu.memory_space<vmem>>, vector<1x32x128xf32>
      %53 = vector.shape_cast %52 : vector<1x32x128xf32> to vector<32x128xf32>
      %54 = vector.shape_cast %51 : vector<32x128xf32> to vector<1x32x128xf32>
      tpu.vector_store %arg10[%c0_31, %c0_32, %c0_33], %54 {strides = array<i32>} : memref<1x32x128xf32, #tpu.memory_space<vmem>>, vector<1x32x128xf32>,
    } else {
    }
    return
  }
  func.func @transform_0(%arg0: i32, %arg1: i32, %arg2: i32) -> (i32, i32) {
    %c0_i32 = arith.constant 0 : i32
    %c0_i32_0 = arith.constant 0 : i32
    %c0_i32_1 = arith.constant 0 : i32
    return %c0_i32, %c0_i32_0 : i32, i32
  }
  func.func @transform_1(%arg0: i32, %arg1: i32, %arg2: i32) -> (i32, i32, i32) {
    %c0_i32 = arith.constant 0 : i32
    %c0_i32_0 = arith.constant 0 : i32
    return %arg0, %c0_i32, %arg1 : i32, i32, i32
  }
  func.func @transform_2(%arg0: i32, %arg1: i32, %arg2: i32) -> (i32, i32, i32) {
    %c0_i32 = arith.constant 0 : i32
    %0 = arith.cmpi eq, %arg1, %c0_i32 : i32
    %c0_i32_0 = arith.constant 0 : i32
    %1 = arith.select %0, %arg2, %c0_i32_0 : i32
    %c0_i32_1 = arith.constant 0 : i32
    %c0_i32_2 = arith.constant 0 : i32
    return %arg0, %c0_i32_1, %1 : i32, i32, i32
  }
  func.func @transform_3(%arg0: i32, %arg1: i32, %arg2: i32) -> (i32, i32) {
    %c0_i32 = arith.constant 0 : i32
    %c0_i32_0 = arith.constant 0 : i32
    %c0_i32_1 = arith.constant 0 : i32
    return %c0_i32, %c0_i32_0 : i32, i32
  }
  func.func @transform_4(%arg0: i32, %arg1: i32, %arg2: i32) -> (i32, i32) {
    %c0_i32 = arith.constant 0 : i32
    %c0_i32_0 = arith.constant 0 : i32
    %c0_i32_1 = arith.constant 0 : i32
    return %c0_i32, %c0_i32_0 : i32, i32
  }
  func.func @transform_5(%arg0: i32, %arg1: i32, %arg2: i32) -> (i32, i32) {
    %c0_i32 = arith.constant 0 : i32
    %c0_i32_0 = arith.constant 0 : i32
    %c0_i32_1 = arith.constant 0 : i32
    return %c0_i32, %c0_i32_0 : i32, i32
  }
  func.func @transform_6(%arg0: i32, %arg1: i32, %arg2: i32) -> (i32, i32) {
    %c0_i32 = arith.constant 0 : i32
    %c0_i32_0 = arith.constant 0 : i32
    %c0_i32_1 = arith.constant 0 : i32
    return %c0_i32, %c0_i32_0 : i32, i32
  }
  func.func @transform_7(%arg0: i32, %arg1: i32, %arg2: i32) -> (i32, i32, i32) {
    %c0_i32 = arith.constant 0 : i32
    %c0_i32_0 = arith.constant 0 : i32
    return %arg0, %c0_i32, %arg1 : i32, i32, i32
  }
}

</mosaic_0001>

<bundles_post_ra>
// kernel: tpu_custom_call.1
= control target key start
LH: loop header
LB: loop body
LE: loop exit
PB: predicated region body
PF: predicated region fallthrough
CT: control target
= control target key end

     0   :  { %s3361_s0 = inlined_call_operand.<no memory space> [shape: f32[1,1], index: 0, kind: input, shape index: {}]   ;;  %s3362_s1 = inlined_call_operand.vmem [shape: bf16[2,32,256], index: 1, kind: input, shape index: {}]   ;;  %s3363_s2 = inlined_call_operand.hbm [shape: bf16[2,32,256], index: 2, kind: input, shape index: {}]   ;;  %s3364_s3 = inlined_call_operand.vmem [shape: bf16[32,4], index: 3, kind: input, shape index: {}]   ;;  %s3365_s4 = inlined_call_operand.vmem [shape: f32[1,4], index: 4, kind: input, shape index: {}]   ;;  %s3366_s5 = inlined_call_operand.vmem [shape: bf16[36,32], index: 5, kind: input, shape index: {}]   ;;  %s3367_s6 = inlined_call_operand.vmem [shape: f32[36,1], index: 6, kind: input, shape index: {}]   ;;  %s3368_s7 = inlined_call_operand.hbm [shape: f32[2,32,256], index: 7, kind: output, shape index: {}]  }
   0x1   :  { %3376 = sst [smem:[#allocation20_spill]] %s3362_s1 }
   0x2   :  { %3377 = sst [smem:[#allocation21_spill]] %s3363_s2 }
   0x3   :  { %3378 = sst [smem:[#allocation22_spill]] %s3365_s4 }
   0x4   :  { %3379 = sst [smem:[#allocation23_spill]] %s3366_s5 }
   0x5   :  { %3380 = sst [smem:[#allocation24_spill]] %s3367_s6 }
   0x6   :  { %3381 = sst [smem:[#allocation25_spill]] %s3368_s7 }
   0x7   :  { %12 = sst [smem:[#allocation7]] %s3361_s0 }
   0x8   :  { %13 = vsyncpa [#allocation10], 0 }
   0x9   :  { %15 = vsyncpa [#allocation10 + $0x1], 0 }
   0xa   :  { %16 = vsyncpa [#allocation11], 0 }
   0xb   :  { %18 = vsyncpa [#allocation11 + $0x1], 0  ;;  %s2600_s26 = smov 0   ;;  %s2602_s27 = smov 0  }
   0xc   :  { %s2604_s28 = smov 0   ;;  %s2606_s29 = smov 0  }
   0xd   :  { %s2608_s30 = smov 0   ;;  %s2610_s8 = smov 0  }
   0xe   :  { %s2612_s9 = smov 0   ;;  %s2614_s10 = smov 0  }
   0xf   :  { %s2616_s0 = smov 0   ;;  %s2618_s11 = smov 0  }
  0x10   :  { %s2620_s12 = smov 0   ;;  %s2622_s13 = smov 0  }
  0x11   :  { %s2624_s14 = smov 0  }
  0x12 LB: > { %3382 = sst [smem:[#allocation15_spill]] %s2520_s10  ;;  %s36_s17 = sadd.s32 1, %s2528_s11  ;;  %s2540_s14 = sphi %s2624_s14, %s24_s14   ;;  %s2536_s13 = sphi %s2622_s13, %s3422_s13   ;;  %s2532_s12 = sphi %s2620_s12, %s3421_s12   ;;  %s2528_s11 = sphi %s2618_s11, %s3420_s11   ;;  %s2524_s0 = sphi %s2616_s0, %s3419_s0   ;;  %s2520_s10 = sphi %s2614_s10, %s3418_s10   ;;  %s2516_s9 = sphi %s2612_s9, %s3409_s9   ;;  %s2512_s8 = sphi %s2610_s8, %s3417_s8   ;;  %s2508_s30 = sphi %s2608_s30, %s3416_s30   ;;  %s2504_s29 = sphi %s2606_s29, %s3415_s29   ;;  %s2500_s28 = sphi %s2604_s28, %s3414_s28   ;;  %s2496_s27 = sphi %s2602_s27, %s3413_s27   ;;  %s2492_s26 = sphi %s2600_s26, %s3412_s26  }
  0x13   : > { %3383 = sst [smem:[#allocation16_spill]] %s2524_s0  ;;  %s39_s18 = sadd.s32 1, %s2532_s12 }
  0x14   : > { %3384 = sst [smem:[#allocation17_spill]] %s2528_s11  ;;  %p37_p0 = scmp.ge.s32.totalorder %s36_s17, 2 }
  0x15   : > { %s43_s19 = sadd.s32 1, %s2536_s13  ;;  %s73_s20 = sadd.s32 1, %s2512_s8 }
  0x16   : > { %p80_p1 = scmp.ne.s32.totalorder %s2512_s8, %s2508_s30  ;;  %s3424_s17 = smov (%p37_p0, %s36_s17), 0 }
  0x17   : > { %s3426_s18 = smov (!%p37_p0, %s39_s18), %s2532_s12  ;;  %p81_p2 = scmp.eq.s32.totalorder %s2540_s14, 0 }
  0x18   : > { %p96_p3 = scmp.eq.s32.totalorder %s2532_s12, 0  ;;  %p41_p4 = scmp.ge.s32.totalorder %s3426_s18, 2 }
  0x19   : > { %s105_s21 = sadd.s32 1, %s2504_s29  ;;  %p2682_p5 = por %p81_p2, %p80_p1 }
  0x1a   : > { %p112_p6 = scmp.ne.s32.totalorder %s2504_s29, %s2500_s28  ;;  %s3428_s18 = smov (%p41_p4, %s3426_s18), 0 }
  0x1b   : > { %3386 = sst [smem:[#allocation18_spill]] %s3428_s18  ;;  %s3430_s19 = smov (!%p41_p4, %s43_s19), %s2536_s13 }
  0x1c   : > { %s69_s23 = ssub.s32 %s2532_s12, %s3428_s18  ;;  %p98_p7 = scmp.eq.s32.totalorder %s3428_s18, 0 }
  0x1d   : > { %p45_p8 = scmp.ge.s32.totalorder %s3430_s19, 2  ;;  %p2694_p9 = por %p112_p6, %p81_p2 }
  0x1e   : > { %s2699_s25 = scalar_select %p96_p3, %s2528_s11, 0 }
  0x1f   : > { %s3432_s19 = smov (%p45_p8, %s3430_s19), 0  ;;  %p118_p10 = scmp.ne.s32.totalorder %s2500_s28, %s2496_s27 }
  0x20   : > { %3388 = sst [smem:[#allocation19_spill]] %s3432_s19  ;;  %s68_s15 = ssub.s32 %s2536_s13, %s3432_s19 }
  0x21   : > { %s99_s16 = scalar_select %p98_p7, %s3424_s17, 0 }
  0x22   : > { %s70_s18 = sor.u32 %s69_s23, %s68_s15  ;;  %s3389_s5 = sadd.s32 4294967295, %s2540_s14  }
  0x23   : > { %s101_s7 = ssub.s32 %s2699_s25, %s99_s16  ;;  %p71_p11 = scmp.eq.s32.totalorder %s70_s18, 0 }
  0x24   : > { %s102_s0 = sor.u32 %s101_s7, %s68_s15  ;;  %p119_p13 = scmp.eq.s32.totalorder %s3389_s5, 0 }
  0x25   : > { %p103_p12 = scmp.eq.s32.totalorder %s102_s0, 0  ;;  %s3391_s4 = smov %s3389_s5 }
  0x26   : > { %s2712_s6 = scalar_select %p71_p11, %s2512_s8, %s73_s20  }
  0x27   : > { %s2715_s11 = scalar_select %p103_p12, %s2504_s29, %s105_s21  }
  0x28   : > { %p2717_p0 = por %p119_p13, %p118_p10  ;;  %p228_p2 = scmp.eq.s32.totalorder %s3391_s4, 7 }
  0x29   : > { %p233_p3 = scmp.ne.s32.totalorder %s2508_s30, %s2492_s26  ;;  %s3392_s19 = sadd.s32 4294967294, %s2540_s14  }
  0x2a   : > { %p234_p4 = scmp.eq.s32.totalorder %s3392_s19, 7  ;;  %p2730_p6 = por %p228_p2, %p80_p1 }
  0x2b   : > { %p1929_p8 = scmp.ge.s32.totalorder %s2540_s14, 8 }
  0x2c   : > { %s3393_s27 = scalar_select %p2730_p6, 1, 0 }
  0x2d   : > { %p2734_p7 = por %p234_p4, %p233_p3  ;;  %265 = sbr.rel (%p1929_p8) target bundleno = 97 (0x61), region = 36 }
  0x2f   : > { %s3394_s5 = scalar_select %p2734_p7, 1, 0 }
  0x34   : > { %268 = sbr.rel (!%p2682_p5) target bundleno = 64 (0x40), region = 40  ;;  %s270_s4 = sand.u32 (%p2682_p5), 1, %s2512_s8  }
  0x35   : > { %s1931_s7 = sshll.u32 (%p2682_p5), %s2536_s13, 3  ;;  %s1930_s0 = sshll.u32 (%p2682_p5), %s270_s4, 4 }
  0x36   : > { %s274_s15 = sadd.s32 (%p2682_p5), %s2532_s12, %s1931_s7  ;;  %s3395_s1 = sld [smem:[#allocation20_spill]] (%p2682_p5) }
  0x37   : > { %s1932_s16 = sshll.u32 (%p2682_p5), %s274_s15, 2  ;;  %s272_s21 = scalar_lea.vmem (%p2682_p5), [#allocation8], %s1930_s0 }
  0x3c   : > { %s276_s20 = scalar_lea.vmem %s3395_s1, %s1932_s16 }
  0x3d   : > { %v292_v0 = vld [vmem:[%s276_s20] sm:$0xf]  ;;  %v294_v1 = vld [vmem:[%s276_s20 + $0x8] sm:$0xf]  ;;  %v296_v2 = vld [vmem:[%s276_s20 + $0x10] sm:$0xf] }
  0x3e   : > { %293 = vst [vmem:[%s272_s21] sm:$0xf] %v292_v0  ;;  %295 = vst [vmem:[%s272_s21 + $0x4] sm:$0xf] %v294_v1  ;;  %v298_v3 = vld [vmem:[%s276_s20 + $0x18] sm:$0xf] }
  0x3f   : > { %297 = vst [vmem:[%s272_s21 + $0x8] sm:$0xf] %v296_v2  ;;  %299 = vst [vmem:[%s272_s21 + $0xc] sm:$0xf] %v298_v3 }
  0x40 PF: > { %s331_s22 = sand.u32 1, %s2504_s29   ;;  %s1934_s23 = sshll.u32 %s2536_s13, 3 }
  0x41   : > { %s1933_s4 = sshll.u32 %s331_s22, 4  ;;  %s342_s7 = sadd.s32 %s1934_s23, %s2699_s25 }
  0x42   : > { %s1935_s15 = sshll.u32 %s342_s7, 6  ;;  %s335_s16 = scalar_lea.vmem [#allocation9], %s1933_s4 }
  0x43   : > { %s345_s18 = sshll.u32 %s335_s16, 4  ;;  %s3396_s2 = sld [smem:[#allocation21_spill]]  ;;  %s2755_s18 = int_to_ptr.vmem [resolvable:$true] %s345_s18 }
  0x44   : > { %s2757_s20 = scalar_lea.sflag [#allocation10], %s331_s22 }
  0x49   : > { %s2753_s0 = scalar_lea.hbm %s3396_s2, %s1935_s15  ;;  %s2378_s4 = scalar_lea.hbm %s3396_s2, 1024 }
  0x4a   : > { %s2374_s21 = scalar_lea.hbm %s2753_s0, 256  ;;  %p2379_p11 = scmp.lt.u32.totalorder %s2753_s0, %s3396_s2 }
  0x4b   : > { %p2375_p1 = scmp.ne.s32.totalorder %s2753_s0, %s2374_s21  ;;  %p2380_p12 = scmp.lt.u32.totalorder %s2378_s4, %s2374_s21 }
  0x4c   : > { %p2382_p2 = scmp.lt.u32.totalorder %s2374_s21, %s2753_s0 }
  0x4d   : > { %p2376_p5 = pnand %p2375_p1, %p2694_p9  ;;  %p2381_p13 = por %p2380_p12, %p2379_p11 }
  0x4f   : > { %p2377_p10 = pneg %p2376_p5  ;;  %p2383_p3 = por %p2382_p2, %p2381_p13 }
  0x51   : > { %p2384_p4 = pnand %p2383_p3, %p2377_p10 }
  0x53   : > { %2387 = shalt.err (!%p2384_p4)
}
  0x54   : > { %s2388_s22 = scalar_lea.vmem %s2755_s18, 256  ;;  %s2542_s15 = smov [#allocation9]  }
  0x55   : > { %p2389_p8 = scmp.ne.s32.totalorder %s2755_s18, %s2388_s22  ;;  %s2392_s16 = sshll.u32 %s2542_s15, 4  ;;  %s2393_s16 = int_to_ptr.vmem [resolvable:$false] %s2392_s16 }
  0x56   : > { %s2394_s19 = scalar_lea.vmem %s2393_s16, 512  ;;  %p2395_p7 = scmp.lt.s32.totalorder %s2755_s18, %s2393_s16 }
  0x57   : > { %p2390_p1 = pnand %p2389_p8, %p2694_p9  ;;  %p2396_p6 = scmp.lt.s32.totalorder %s2394_s19, %s2388_s22 }
  0x59   : > { %p2391_p5 = pneg %p2390_p1  ;;  %p2397_p11 = por %p2396_p6, %p2395_p7 }
  0x5b   : > { %p2398_p12 = pnand %p2397_p11, %p2391_p5 }
  0x5d   : > { %2401 = shalt.err (!%p2398_p12)
}
  0x5e   : > { %s2543_s21 = smov 128   ;;  %s2544_s25 = smov 64  }
  0x5f   : > { %s2545_s23 = smov 4  }
  0x60   : > { %2137 = dma.hbm_to_vmem [thread:$0]  (%p2694_p9), %s2753_s0, 256, %s2755_s18, %s2757_s20, %s2543_s21, %s2544_s25, %s2545_s23  }
  0x61 PF: > { %p1936_p10 = scmp.ge.s32.totalorder %s2540_s14, 1  ;;  %p353_p13 = scmp.lt.s32.totalorder %s2540_s14, 9 }
  0x63   : > { %p354_p2 = pnand %p1936_p10, %p353_p13 }
  0x64   : > { %s2784_s4 = sand.u32 (!%p354_p2), 1, %s2508_s30   ;;  %s366_s1 = sand.u32 (!%p354_p2), 1, %s2500_s28  }
  0x65   : > { %357 = sbr.rel (%p354_p2) target bundleno = 1818 (0x71a), region = 85  ;;  %s1937_s7 = sshll.u32 (!%p354_p2), %s2784_s4, 4 }
  0x66   : > { %s2788_s22 = sshll.u32 (!%p354_p2), %s366_s1, 4  ;;  %s2790_s24 = scalar_lea.vmem (!%p354_p2), [#allocation8], %s1937_s7 }
  0x67   : > { %s367_s18 = scalar_lea.sflag (!%p354_p2), [#allocation10], %s366_s1  ;;  %s370_s0 = scalar_lea.vmem (!%p354_p2), [#allocation9], %s2788_s22 }
  0x6c   : > { %2483 = dma.done.wait (%p2717_p0), %s367_s18, 256  }
  0x6d   : > { %2485 = vsyncadd (%p2717_p0), %s367_s18, 4294967040  ;;  %s1939_s20 = sshll.u32 %s2784_s4, 5  ;;  %p1940_p9 = scmp.ne.s32.totalorder %s2516_s9, 0 }
  0x6e   : > { %s2798_s15 = scalar_lea.vmem [#allocation12], %s1939_s20  ;;  %v1992_v4 = vld [vmem:[%s2790_s24] sm:$0xff] (!%p1940_p9)   ;;  %v2803_v7 = vld [vmem:[%s2790_s24 + $0x8] sm:$0xff] (!%p1940_p9)   ;;  %vm483_vm0 = vcmask (!%p1940_p9), 261120   ;;  %v2546_v10 = vmov (!%p1940_p9), 0.0   ;;  %vm622_vm1 = vcmask (!%p1940_p9), 7168  }
  0x6f   : > { %411 = sbr.rel (%p1940_p9) target bundleno = 524 (0x20c), region = 97  ;;  %v1993_v5 = vunpack.c.l.bf16 (!%p1940_p9), %v1992_v4  ;;  %v1994_v6 = vunpack.c.h.bf16 (!%p1940_p9), %v1992_v4  ;;  %v1997_v8 = vunpack.c.l.bf16 (!%p1940_p9), %v2803_v7  ;;  %v2263_v9 = vld [vmem:[%s3364_s3] sm:$0xff] (!%p1940_p9)   ;;  %655 = vst.msk [vmem:[#allocation5] sm:$0xff] (!%p1940_p9), %vm483_vm0, %v2546_v10  ;;  %656 = vst.msk [vmem:[#allocation5 + $0x8] sm:$0xff] (!%p1940_p9), %vm483_vm0, %v2546_v10  ;;  %v1998_v11 = vunpack.c.h.bf16 (!%p1940_p9), %v2803_v7  ;;  %v2264_v13 = vld [vmem:[%s3364_s3 + $0x8] sm:$0xff] (!%p1940_p9)   ;;  %s3397_s1 = sld [smem:[#allocation22_spill]] (!%p1940_p9) }
  0x70   : > { %657 = vst.msk [vmem:[#allocation5 + $0x10] sm:$0xff] (!%p1940_p9), %vm483_vm0, %v2546_v10  ;;  %658 = vst.msk [vmem:[#allocation5 + $0x18] sm:$0xff] (!%p1940_p9), %vm483_vm0, %v2546_v10  ;;  %2054 = vmatprep.subr.bf16.mxu0 (!%p1940_p9), %v2263_v9  ;;  %2128 = vmatprep.subr.bf16.mxu1 (!%p1940_p9), %v2263_v9  ;;  %v2547_v12 = vmov (!%p1940_p9), -inf   ;;  %vm613_vm2 = vcmask (!%p1940_p9), 31744  }
  0x71   : > { %420 = vxpose.xlu0.b32.start [1/4] (short) (!%p1940_p9), %v1993_v5, 128  ;;  %659 = vst.msk [vmem:[#allocation5 + $0x20] sm:$0xff] (!%p1940_p9), %vm483_vm0, %v2546_v10  ;;  %660 = vst.msk [vmem:[#allocation5 + $0x28] sm:$0xff] (!%p1940_p9), %vm483_vm0, %v2546_v10  ;;  %2055 = vmatpush3.bf16.msra.mxu0 (!%p1940_p9), %v2263_v9 }
  0x72   : > { %661 = vst.msk [vmem:[#allocation5 + $0x30] sm:$0xff] (!%p1940_p9), %vm483_vm0, %v2546_v10  ;;  %662 = vst.msk [vmem:[#allocation5 + $0x38] sm:$0xff] (!%p1940_p9), %vm483_vm0, %v2546_v10  ;;  %2130 = vmatpush3.bf16.msra.mxu1 (!%p1940_p9), %v2263_v9  ;;  %2056 = vmatprep.subr.bf16.mxu0 (!%p1940_p9), %v2264_v13 }
  0x73   : > { %663 = vst.msk [vmem:[#allocation5 + $0x40] sm:$0xff] (!%p1940_p9), %vm483_vm0, %v2546_v10  ;;  %664 = vst.msk [vmem:[#allocation5 + $0x48] sm:$0xff] (!%p1940_p9), %vm483_vm0, %v2546_v10  ;;  %2129 = vmatprep.subr.bf16.mxu1 (!%p1940_p9), %v2264_v13 }
  0x74   : > { %665 = vst.msk [vmem:[#allocation5 + $0x50] sm:$0xff] (!%p1940_p9), %vm483_vm0, %v2546_v10  ;;  %666 = vst.msk [vmem:[#allocation5 + $0x58] sm:$0xff] (!%p1940_p9), %vm483_vm0, %v2546_v10 }
  0x75   : > { %421 = vxpose.xlu0.b32.cont [2/4] (short) (!%p1940_p9), %v1994_v6, 128  ;;  %667 = vst.msk [vmem:[#allocation5 + $0x60] sm:$0xff] (!%p1940_p9), %vm483_vm0, %v2546_v10  ;;  %668 = vst.msk [vmem:[#allocation5 + $0x68] sm:$0xff] (!%p1940_p9), %vm483_vm0, %v2546_v10  ;;  %2057 = vmatpush3.bf16.msra.mxu0 (!%p1940_p9), %v2264_v13  ;;  %v1941_v39 = vld [vmem:[%s3397_s1] ss:$0 sm:$0xff] (!%p1940_p9) }
  0x76   : > { %669 = vst.msk [vmem:[#allocation5 + $0x70] sm:$0xff] %vm483_vm0, %v2546_v10  ;;  %670 = vst.msk [vmem:[#allocation5 + $0x78] sm:$0xff] %vm483_vm0, %v2546_v10  ;;  %2131 = vmatpush3.bf16.msra.mxu1 %v2264_v13 }
  0x77   : > { %623 = vst.msk [vmem:[#allocation3] sm:$0xff] %vm622_vm1, %v2547_v12  ;;  %624 = vst.msk [vmem:[#allocation3 + $0x8] sm:$0xff] %vm622_vm1, %v2547_v12 }
  0x78   : > { %625 = vst.msk [vmem:[#allocation3 + $0x10] sm:$0xff] %vm622_vm1, %v2547_v12  ;;  %626 = vst.msk [vmem:[#allocation3 + $0x18] sm:$0xff] %vm622_vm1, %v2547_v12 }
  0x79   : > { %422 = vxpose.xlu0.b32.cont [3/4] (short) %v1997_v8, 128  ;;  %627 = vst.msk [vmem:[#allocation3 + $0x20] sm:$0xff] %vm622_vm1, %v2547_v12  ;;  %628 = vst.msk [vmem:[#allocation3 + $0x28] sm:$0xff] %vm622_vm1, %v2547_v12 }
  0x7a   : > { %629 = vst.msk [vmem:[#allocation3 + $0x30] sm:$0xff] %vm622_vm1, %v2547_v12  ;;  %630 = vst.msk [vmem:[#allocation3 + $0x38] sm:$0xff] %vm622_vm1, %v2547_v12 }
  0x7b   : > { %631 = vst.msk [vmem:[#allocation3 + $0x40] sm:$0xff] %vm622_vm1, %v2547_v12  ;;  %632 = vst.msk [vmem:[#allocation3 + $0x48] sm:$0xff] %vm622_vm1, %v2547_v12 }
  0x7c   : > { %633 = vst.msk [vmem:[#allocation3 + $0x50] sm:$0xff] %vm622_vm1, %v2547_v12  ;;  %634 = vst.msk [vmem:[#allocation3 + $0x58] sm:$0xff] %vm622_vm1, %v2547_v12 }
  0x7d   : > { %635 = vst.msk [vmem:[#allocation3 + $0x60] sm:$0xff] %vm622_vm1, %v2547_v12  ;;  %636 = vst.msk [vmem:[#allocation3 + $0x68] sm:$0xff] %vm622_vm1, %v2547_v12  ;;  %423 = vxpose.xlu0.b32.end [4/4] (short) %v1998_v11, 128 }
  0x7e   : > { %637 = vst.msk [vmem:[#allocation3 + $0x70] sm:$0xff] %vm622_vm1, %v2547_v12  ;;  %638 = vst.msk [vmem:[#allocation3 + $0x78] sm:$0xff] %vm622_vm1, %v2547_v12 }
  0x7f   : > { %639 = vst.msk [vmem:[#allocation4] sm:$0xff] %vm622_vm1, %v2546_v10  ;;  %640 = vst.msk [vmem:[#allocation4 + $0x8] sm:$0xff] %vm622_vm1, %v2546_v10 }
  0x80   : > { %641 = vst.msk [vmem:[#allocation4 + $0x10] sm:$0xff] %vm622_vm1, %v2546_v10  ;;  %642 = vst.msk [vmem:[#allocation4 + $0x18] sm:$0xff] %vm622_vm1, %v2546_v10 }
  0x81   : > { %643 = vst.msk [vmem:[#allocation4 + $0x20] sm:$0xff] %vm622_vm1, %v2546_v10  ;;  %644 = vst.msk [vmem:[#allocation4 + $0x28] sm:$0xff] %vm622_vm1, %v2546_v10 }
  0x82   : > { %645 = vst.msk [vmem:[#allocation4 + $0x30] sm:$0xff] %vm622_vm1, %v2546_v10  ;;  %646 = vst.msk [vmem:[#allocation4 + $0x38] sm:$0xff] %vm622_vm1, %v2546_v10 }
  0x83   : > { %647 = vst.msk [vmem:[#allocation4 + $0x40] sm:$0xff] %vm622_vm1, %v2546_v10  ;;  %648 = vst.msk [vmem:[#allocation4 + $0x48] sm:$0xff] %vm622_vm1, %v2546_v10 }
  0x84   : > { %649 = vst.msk [vmem:[#allocation4 + $0x50] sm:$0xff] %vm622_vm1, %v2546_v10  ;;  %650 = vst.msk [vmem:[#allocation4 + $0x58] sm:$0xff] %vm622_vm1, %v2546_v10 }
  0x85   : > { %651 = vst.msk [vmem:[#allocation4 + $0x60] sm:$0xff] %vm622_vm1, %v2546_v10  ;;  %652 = vst.msk [vmem:[#allocation4 + $0x68] sm:$0xff] %vm622_vm1, %v2546_v10 }
  0x86   : > { %653 = vst.msk [vmem:[#allocation4 + $0x70] sm:$0xff] %vm622_vm1, %v2546_v10  ;;  %654 = vst.msk [vmem:[#allocation4 + $0x78] sm:$0xff] %vm622_vm1, %v2546_v10 }
  0xf1   : > { %v436_v14 = vpop.trf.xlu0 }
  0xf5   : > { %v437_v15 = vpop.trf.xlu0 }
  0xf6   : > { %v452_v16 = vpack.c.bf16 %v437_v15, %v436_v14 }
  0xf8   : > { %2058 = vmatprep.mubr.msk.bf16.mxu0 %vm483_vm0, %v452_v16 }
  0xf9   : > { %v438_v17 = vpop.trf.xlu0 }
  0xfd   : > { %v439_v18 = vpop.trf.xlu0 }
  0xfe   : > { %v453_v19 = vpack.c.bf16 %v439_v18, %v438_v17 }
 0x100   : > { %2059 = vmatmul.mubr.msk.bf16.vlgmr.msra.gmra.mrb[0].mxu0 %vm483_vm0, %v453_v19 }
 0x101   : > { %v440_v20 = vpop.trf.xlu0 }
 0x105   : > { %v441_v21 = vpop.trf.xlu0 }
 0x106   : > { %v454_v22 = vpack.c.bf16 %v441_v21, %v440_v20 }
 0x108   : > { %2062 = vmatprep.mubr.msk.bf16.mxu0 %vm483_vm0, %v454_v22 }
 0x109   : > { %v442_v23 = vpop.trf.xlu0 }
 0x10d   : > { %v443_v24 = vpop.trf.xlu0 }
 0x10e   : > { %v455_v25 = vpack.c.bf16 %v443_v24, %v442_v23 }
 0x110   : > { %2063 = vmatmul.mubr.msk.bf16.gmra.mrb[4].mxu0 %vm483_vm0, %v455_v25 }
 0x111   : > { %v444_v26 = vpop.trf.xlu0 }
 0x115   : > { %v445_v27 = vpop.trf.xlu0 }
 0x116   : > { %v456_v28 = vpack.c.bf16 %v445_v27, %v444_v26 }
 0x118   : > { %2066 = vmatprep.mubr.msk.bf16.mxu1 %vm483_vm0, %v456_v28 }
 0x119   : > { %v446_v29 = vpop.trf.xlu0 }
 0x11d   : > { %v447_v30 = vpop.trf.xlu0 }
 0x11e   : > { %v457_v31 = vpack.c.bf16 %v447_v30, %v446_v29 }
 0x120   : > { %2067 = vmatmul.mubr.msk.bf16.vlgmr.msra.gmra.mrb[0].mxu1 %vm483_vm0, %v457_v31 }
 0x121   : > { %v448_v32 = vpop.trf.xlu0 }
 0x125   : > { %v449_v33 = vpop.trf.xlu0 }
 0x126   : > { %v458_v34 = vpack.c.bf16 %v449_v33, %v448_v32 }
 0x128   : > { %2070 = vmatprep.mubr.msk.bf16.mxu1 %vm483_vm0, %v458_v34 }
 0x129   : > { %v450_v35 = vpop.trf.xlu0 }
 0x12d   : > { %v451_v36 = vpop.trf.xlu0 }
 0x12e   : > { %v459_v37 = vpack.c.bf16 %v451_v36, %v450_v35 }
 0x130   : > { %2071 = vmatmul.mubr.msk.bf16.gmra.mrb[4].mxu1 %vm483_vm0, %v459_v37 }
 0x1d3   : > { %v2060_v38 = vpop.f32.mrb[0].mxu0 }
 0x1d4   : > { %v542_v40 = vpop.f32.mrb[1].mxu0  ;;  %v551_v42 = vadd.f32 %v2060_v38, %v1941_v39 }
 0x1d5   : > { %v2061_v41 = vpop.f32.mrb[2].mxu0  ;;  %v543_v45 = vadd.f32 %v1941_v39, %v542_v40 }
 0x1d6   : > { %v554_v43 = vadd.f32 %v2061_v41, %v1941_v39  ;;  %v545_v44 = vpop.f32.mrb[3].mxu0 }
 0x1d7   : > { %v546_v46 = vadd.f32 %v1941_v39, %v545_v44 }
 0x1d8   : > { %v606_v47 = vpack.c.bf16 %v554_v43, %v551_v42 }
 0x1d9   : > { %v605_v48 = vpack.c.bf16 %v546_v46, %v543_v45 }
 0x1da   : > { %615 = vst.msk [vmem:[#allocation2 + $0x8] sm:$0xff] %vm613_vm2, %v606_v47 }
 0x1db   : > { %614 = vst.msk [vmem:[#allocation2] sm:$0xff] %vm613_vm2, %v605_v48 }
 0x1e3   : > { %v2064_v49 = vpop.f32.mrb[4].mxu0 }
 0x1e4   : > { %v558_v50 = vpop.f32.mrb[5].mxu0  ;;  %v567_v52 = vadd.f32 %v2064_v49, %v1941_v39 }
 0x1e5   : > { %v2065_v51 = vpop.f32.mrb[6].mxu0  ;;  %v559_v55 = vadd.f32 %v1941_v39, %v558_v50 }
 0x1e6   : > { %v570_v53 = vadd.f32 %v2065_v51, %v1941_v39  ;;  %v561_v54 = vpop.f32.mrb[7].mxu0 }
 0x1e7   : > { %v562_v56 = vadd.f32 %v1941_v39, %v561_v54 }
 0x1e8   : > { %v608_v57 = vpack.c.bf16 %v570_v53, %v567_v52 }
 0x1e9   : > { %v607_v58 = vpack.c.bf16 %v562_v56, %v559_v55 }
 0x1ea   : > { %617 = vst.msk [vmem:[#allocation2 + $0x18] sm:$0xff] %vm613_vm2, %v608_v57 }
 0x1eb   : > { %616 = vst.msk [vmem:[#allocation2 + $0x10] sm:$0xff] %vm613_vm2, %v607_v58 }
 0x1f3   : > { %v2068_v59 = vpop.f32.mrb[0].mxu1 }
 0x1f4   : > { %v574_v60 = vpop.f32.mrb[1].mxu1  ;;  %v583_v62 = vadd.f32 %v2068_v59, %v1941_v39 }
 0x1f5   : > { %v2069_v61 = vpop.f32.mrb[2].mxu1  ;;  %v575_v1 = vadd.f32 %v1941_v39, %v574_v60 }
 0x1f6   : > { %v586_v63 = vadd.f32 %v2069_v61, %v1941_v39  ;;  %v577_v0 = vpop.f32.mrb[3].mxu1 }
 0x1f7   : > { %v578_v2 = vadd.f32 %v1941_v39, %v577_v0 }
 0x1f8   : > { %v610_v3 = vpack.c.bf16 %v586_v63, %v583_v62 }
 0x1f9   : > { %v609_v4 = vpack.c.bf16 %v578_v2, %v575_v1 }
 0x1fa   : > { %619 = vst.msk [vmem:[#allocation2 + $0x28] sm:$0xff] %vm613_vm2, %v610_v3 }
 0x1fb   : > { %618 = vst.msk [vmem:[#allocation2 + $0x20] sm:$0xff] %vm613_vm2, %v609_v4 }
 0x203   : > { %v2072_v5 = vpop.f32.mrb[4].mxu1 }
 0x204   : > { %v590_v6 = vpop.f32.mrb[5].mxu1  ;;  %v599_v8 = vadd.f32 %v2072_v5, %v1941_v39 }
 0x205   : > { %v2073_v7 = vpop.f32.mrb[6].mxu1  ;;  %v591_v11 = vadd.f32 %v1941_v39, %v590_v6 }
 0x206   : > { %v602_v9 = vadd.f32 %v2073_v7, %v1941_v39  ;;  %v593_v10 = vpop.f32.mrb[7].mxu1 }
 0x207   : > { %v594_v12 = vadd.f32 %v1941_v39, %v593_v10 }
 0x208   : > { %v612_v13 = vpack.c.bf16 %v602_v9, %v599_v8 }
 0x209   : > { %v611_v14 = vpack.c.bf16 %v594_v12, %v591_v11 }
 0x20a   : > { %621 = vst.msk [vmem:[#allocation2 + $0x38] sm:$0xff] %vm613_vm2, %v612_v13 }
 0x20b   : > { %620 = vst.msk [vmem:[#allocation2 + $0x30] sm:$0xff] %vm613_vm2, %v611_v14 }
 0x20c PF: > { %s3398_s7 = sld [smem:[#allocation15_spill]] }
 0x212   : > { %p1952_p0 = scmp.ne.s32.totalorder %s3398_s7, 0 }
 0x213   : > { %v2267_v15 = vld [vmem:[%s370_s0] sm:$0xff] (!%p1952_p0)   ;;  %v2548_v16 = vmov (!%p1952_p0), 0.0   ;;  %v2268_v17 = vld [vmem:[%s370_s0 + $0x8] sm:$0xff] (!%p1952_p0)   ;;  %vm2549_vm3 = vmmov (!%p1952_p0), 0   ;;  %s3399_s10 = sld [smem:[#allocation24_spill]] (!%p1952_p0)  ;;  %s3401_s25 = sld [smem:[#allocation23_spill]] (!%p1952_p0) }
 0x214   : > { %674 = sbr.rel (%p1952_p0) target bundleno = 765 (0x2fd), region = 101  ;;  %2074 = vmatprep.subr.bf16.mxu0 (!%p1952_p0), %v2548_v16  ;;  %2132 = vmatprep.subr.bf16.mxu1 (!%p1952_p0), %v2548_v16  ;;  %v2550_v21 = vmov (!%p1952_p0), 0   ;;  %vm739_vm4 = vcmask (!%p1952_p0), 261120  }
 0x215   : > { %2075 = vmatpush3.bf16.msra.mxu0 (!%p1952_p0), %v2267_v15  ;;  %2134 = vmatpush3.bf16.msra.mxu1 (!%p1952_p0), %v2267_v15  ;;  %s1989_s22 = smul.u32 (!%p1952_p0), 20, %s2516_s9 }
 0x216   : > { %2076 = vmatprep.subr.bf16.mxu0 (!%p1952_p0), %v2548_v16  ;;  %2133 = vmatprep.subr.bf16.mxu1 (!%p1952_p0), %v2548_v16 }
 0x217   : > { %2078 = vmatprep.mubr.msk.bf16.mxu0 (!%p1952_p0), %vm2549_vm3, %v2548_v16  ;;  %2082 = vmatprep.mubr.msk.bf16.mxu1 (!%p1952_p0), %vm2549_vm3, %v2548_v16  ;;  %s828_s0 = scalar_lea.vmem (!%p1952_p0), [#allocation6], %s1989_s22 }
 0x218   : > { %2265 = vset.pattern.permute.xlu0 (!%p1952_p0), %v2550_v21  ;;  %2266 = vset.pattern.permute.xlu1 (!%p1952_p0), %v2550_v21 }
 0x219   : > { %s3400_s16 = smov (!%p1952_p0), %s3399_s10  ;;  %v684_v18 = vld [vmem:[%s3399_s10] sm:$0xff] (!%p1952_p0)  ;;  %v2270_v20 = vld [vmem:[%s3401_s25 + $0x8] sm:$0xff] (!%p1952_p0)   ;;  %2077 = vmatpush3.bf16.msra.mxu0 (!%p1952_p0), %v2268_v17  ;;  %2135 = vmatpush3.bf16.msra.mxu1 (!%p1952_p0), %v2268_v17  ;;  %v2271_v26 = vld [vmem:[%s3401_s25 + $0x10] ss:$0 sps:$4 sm:$0x33] (!%p1952_p0)  }
 0x21a   : > { %v2269_v19 = vld [vmem:[%s3401_s25] sm:$0xff] (!%p1952_p0)   ;;  %v686_v22 = vld [vmem:[%s3400_s16 + $0x10] sm:$0xff] (!%p1952_p0)  ;;  %691 = vperm.xlu0 (!%p1952_p0), %2265, %v684_v18   ;;  %v685_v23 = vld [vmem:[%s3400_s16 + $0x8] sm:$0xff] (!%p1952_p0) }
 0x21b   : > { %701 = vperm.xlu1 %2266, %v686_v22   ;;  %v687_v24 = vld [vmem:[%s3400_s16 + $0x18] sm:$0xff]  ;;  %v688_v25 = vld [vmem:[%s3400_s16 + $0x20] sm:$0xf] }
 0x21c   : > { %2079 = vmatmul.mubr.msk.bf16.vlgmr.msra.gmra.mrb[0].mxu0 %vm739_vm4, %v2269_v19  ;;  %2083 = vmatmul.mubr.msk.bf16.vlgmr.msra.gmra.mrb[0].mxu1 %vm739_vm4, %v2270_v20 }
 0x21d   : > { %2086 = vmatprep.mubr.msk.bf16.mxu1 %vm2549_vm3, %v2548_v16 }
 0x21e   : > { %696 = vperm.xlu0 %2265, %v685_v23  }
 0x21f   : > { %706 = vperm.xlu1 %2266, %v687_v24  }
 0x222   : > { %711 = vperm.xlu0 %2265, %v688_v25  }
 0x224   : > { %2087 = vmatmul.mubr.msk.bf16.gmra.mrb[4].mxu1 %vm739_vm4, %v2271_v26 }
 0x299   : > { %v692_v27 = vpop.permute.xlu0 %691 }
 0x29a   : > { %v702_v28 = vpop.permute.xlu1 %701 }
 0x29d   : > { %v697_v29 = vpop.permute.xlu0 %696 }
 0x29e   : > { %v707_v30 = vpop.permute.xlu1 %706 }
 0x2a1   : > { %v712_v45 = vpop.permute.xlu0 %711 }
 0x2ef   : > { %v783_v31 = vpop.f32.mrb[0].mxu0  ;;  %v791_v32 = vpop.f32.mrb[0].mxu1 }
 0x2f0   : > { %v2080_v33 = vpop.f32.mrb[1].mxu0  ;;  %v2084_v34 = vpop.f32.mrb[1].mxu1  ;;  %v784_v37 = vadd.f32 %v783_v31, %v692_v27  ;;  %v792_v38 = vadd.f32 %v791_v32, %v702_v28 }
 0x2f1   : > { %v786_v35 = vpop.f32.mrb[2].mxu0  ;;  %v794_v36 = vpop.f32.mrb[2].mxu1 }
 0x2f2   : > { %v787_v39 = vadd.f32 %v786_v35, %v697_v29  ;;  %v795_v40 = vadd.f32 %v794_v36, %v707_v30  ;;  %v2085_v41 = vpop.f32.mrb[3].mxu1  ;;  %v2081_v42 = vpop.f32.mrb[3].mxu0 }
 0x2f4   : > { %v2002_v43 = vpack.c.bf16 %v787_v39, %v784_v37  ;;  %v2007_v44 = vpack.c.bf16 %v795_v40, %v792_v38 }
 0x2f6   : > { %2003 = vst [vmem:[%s828_s0] sm:$0xff] %v2002_v43   ;;  %2018 = vst [vmem:[%s828_s0 + $0x8] sm:$0xff] %v2007_v44  }
 0x2f7   : > { %v799_v46 = vpop.f32.mrb[4].mxu1 }
 0x2f8   : > { %v800_v47 = vadd.f32 %v799_v46, %v712_v45  ;;  %v2088_v48 = vpop.f32.mrb[5].mxu1 }
 0x2f9   : > { %v802_v49 = vpop.f32.mrb[6].mxu1 }
 0x2fa   : > { %v1988_v50 = vpack.c.bf16 %v800_v47, %v800_v47  ;;  %v2089_v51 = vpop.f32.mrb[7].mxu1 }
 0x2fc   : > { %833 = vst [vmem:[%s828_s0 + $0x10] sm:$0x3] %v1988_v50 }
 0x2fd PF: > { %s1990_s7 = smul.u32 20, %s2516_s9  ;;  %v842_v52 = vld [vmem:[#allocation2] sm:$0xff]  ;;  %vm850_vm5 = vcmask 31744   ;;  %vm875_vm6 = vcmask 1041408   ;;  %v843_v55 = vld [vmem:[#allocation2 + $0x8] sm:$0xff]  ;;  %v844_v56 = vld [vmem:[#allocation2 + $0x10] sm:$0xff] }
 0x2fe   : > { %2092 = vmatprep.mubr.msk.bf16.mxu0 %vm850_vm5, %v842_v52  ;;  %v845_v57 = vld [vmem:[#allocation2 + $0x18] sm:$0xff]  ;;  %v846_v58 = vld [vmem:[#allocation2 + $0x20] sm:$0xff]  ;;  %v847_v59 = vld [vmem:[#allocation2 + $0x28] sm:$0xff]  ;;  %v2551_v7 = vmov 0   ;;  %vm1296_vm7 = vcmask 7168   ;;  %vm1558_vm8 = vcmask 261120  }
 0x2ff   : > { %s2915_s18 = scalar_lea.vmem [#allocation6], %s1990_s7  ;;  %v848_v60 = vld [vmem:[#allocation2 + $0x30] sm:$0xff]  ;;  %v849_v61 = vld [vmem:[#allocation2 + $0x38] sm:$0xff]  ;;  %2273 = vset.pattern.permute.xlu1 %v2551_v7  ;;  %2272 = vset.pattern.permute.xlu0 %v2551_v7  ;;  %v2975_v16 = vld [vmem:[#allocation3] sm:$0xff]  ;;  %p1978_p6 = scmp.ne.s32.totalorder %s2516_s9, 1 }
 0x300   : > { %v2973_v15 = vld [vmem:[#allocation3 + $0x10] sm:$0xff]  ;;  %v2981_v21 = vld [vmem:[#allocation3 + $0x18] sm:$0xff]  ;;  %v2986_v22 = vld [vmem:[#allocation3 + $0x8] sm:$0xff]  ;;  %s1739_s9 = sld [smem:[#allocation7]] (!%p1978_p6) }
 0x301   : > { %v2998_v27 = vld [vmem:[#allocation3 + $0x20] sm:$0xff]  ;;  %v3002_v28 = vld [vmem:[#allocation3 + $0x38] sm:$0xff]  ;;  %v3011_v33 = vld [vmem:[#allocation3 + $0x30] sm:$0xff] }
 0x302   : > { %v3016_v35 = vld [vmem:[#allocation3 + $0x28] sm:$0xff]  ;;  %v3024_v40 = vld [vmem:[#allocation3 + $0x40] sm:$0xff]  ;;  %v3029_v41 = vld [vmem:[#allocation3 + $0x58] sm:$0xff] }
 0x303   : > { %v841_v53 = vld [vmem:[%s2915_s18 + $0x10] sm:$0x3]  ;;  %v2274_v34 = vld [vmem:[%s2915_s18] sm:$0xff]   ;;  %v2275_v47 = vld [vmem:[%s2915_s18 + $0x8] sm:$0xff]  }
 0x304   : > { %2136 = vmatprep.subr.msk.bf16.mxu0 %vm875_vm6, %v841_v53  ;;  %v877_v54 = vsel %vm875_vm6, %v841_v53, 0  ;;  %2108 = vmatprep.subr.bf16.mxu1 %v2274_v34  ;;  %v3038_v46 = vld [vmem:[#allocation3 + $0x50] sm:$0xff]  ;;  %v3044_v48 = vld [vmem:[#allocation3 + $0x48] sm:$0xff] }
 0x305   : > { %2091 = vmatpush3.bf16.msra.mxu0 %v877_v54  ;;  %2109 = vmatpush3.bf16.xpose.msra.mxu1 %v2274_v34  ;;  %v3053_v54 = vld [vmem:[#allocation3 + $0x60] sm:$0xff]  ;;  %v3068_v7 = vld [vmem:[#allocation3 + $0x70] sm:$0xff] }
 0x306   : > { %2110 = vmatprep.subr.bf16.mxu1 %v2275_v47 }
 0x308   : > { %2093 = vmatmul.mubr.msk.bf16.vlgmr.msra.gmra.mrb[0].mxu0 %vm850_vm5, %v843_v55  ;;  %v3057_v55 = vld [vmem:[#allocation3 + $0x78] sm:$0xff] }
 0x309   : > { %2096 = vmatprep.mubr.msk.bf16.mxu0 %vm850_vm5, %v844_v56 }
 0x30d   : > { %2111 = vmatpush3.bf16.xpose.msra.mxu1 %v2275_v47 }
 0x310   : > { %2097 = vmatmul.mubr.msk.bf16.gmra.mrb[4].mxu0 %vm850_vm5, %v845_v57 }
 0x311   : > { %2100 = vmatprep.mubr.msk.bf16.mxu0 %vm850_vm5, %v846_v58 }
 0x318   : > { %2101 = vmatmul.mubr.msk.bf16.gmra.mrb[8].mxu0 %vm850_vm5, %v847_v59 }
 0x319   : > { %2104 = vmatprep.mubr.msk.bf16.mxu0 %vm850_vm5, %v848_v60 }
 0x320   : > { %2105 = vmatmul.mubr.msk.bf16.gmra.mrb[12].mxu0 %vm850_vm5, %v849_v61 }
 0x3db   : > { %v2925_v62 = vpop.f32.mrb[0].mxu0 }
 0x3dc   : > { %996 = vmax.xlane.f32.xlu1 %v2925_v62  ;;  %v2928_v63 = vpop.f32.mrb[1].mxu0 }
 0x3dd   : > { %992 = vmax.xlane.f32.xlu0 %v2928_v63  ;;  %v2931_v0 = vpop.f32.mrb[2].mxu0 }
 0x3de   : > { %v2933_v1 = vpop.f32.mrb[3].mxu0 }
 0x3e0   : > { %998 = vmax.xlane.f32.xlu1 %v2931_v0 }
 0x3e1   : > { %994 = vmax.xlane.f32.xlu0 %v2933_v1 }
 0x3e3   : > { %v2937_v2 = vpop.f32.mrb[4].mxu0 }
 0x3e4   : > { %v2939_v3 = vpop.f32.mrb[5].mxu0 }
 0x3e5   : > { %1000 = vmax.xlane.f32.xlu0 %v2939_v3  ;;  %v2942_v4 = vpop.f32.mrb[6].mxu0 }
 0x3e6   : > { %1006 = vmax.xlane.f32.xlu1 %v2942_v4  ;;  %v2945_v5 = vpop.f32.mrb[7].mxu0 }
 0x3e9   : > { %1004 = vmax.xlane.f32.xlu0 %v2937_v2 }
 0x3ea   : > { %1002 = vmax.xlane.f32.xlu1 %v2945_v5 }
 0x3eb   : > { %v2949_v6 = vpop.f32.mrb[8].mxu0 }
 0x3ec   : > { %v2951_v8 = vpop.f32.mrb[9].mxu0 }
 0x3ed   : > { %v2953_v9 = vpop.f32.mrb[10].mxu0  ;;  %1008 = vmax.xlane.f32.xlu0 %v2951_v8 }
 0x3ee   : > { %1014 = vmax.xlane.f32.xlu1 %v2953_v9  ;;  %v2957_v10 = vpop.f32.mrb[11].mxu0 }
 0x3f1   : > { %1012 = vmax.xlane.f32.xlu0 %v2949_v6 }
 0x3f2   : > { %1010 = vmax.xlane.f32.xlu1 %v2957_v10 }
 0x3f3   : > { %v2961_v11 = vpop.f32.mrb[12].mxu0 }
 0x3f4   : > { %v2963_v12 = vpop.f32.mrb[13].mxu0 }
 0x3f5   : > { %v2965_v13 = vpop.f32.mrb[14].mxu0  ;;  %1016 = vmax.xlane.f32.xlu0 %v2963_v12 }
 0x3f6   : > { %1022 = vmax.xlane.f32.xlu1 %v2965_v13  ;;  %v2969_v14 = vpop.f32.mrb[15].mxu0 }
 0x3f9   : > { %1020 = vmax.xlane.f32.xlu0 %v2961_v11 }
 0x3fa   : > { %1018 = vmax.xlane.f32.xlu1 %v2969_v14 }
 0x469   : > { %v997_v17 = vpop.xlane.xlu1 %996 }
 0x46a   : > { %v2978_v18 = vmax.f32 %v2973_v15, %v997_v17  ;;  %v993_v19 = vpop.xlane.xlu0 %992 }
 0x46b   : > { %v1024_v20 = vmax.f32 %v2975_v16, %v993_v19 }
 0x46c   : > { %1577 = vst.msk [vmem:[#allocation3 + $0x10] sm:$0xff] %vm1296_vm7, %v2978_v18  ;;  %1100 = vperm.xlu1 %2273, %v2978_v18  }
 0x46d   : > { %1575 = vst.msk [vmem:[#allocation3] sm:$0xff] %vm1296_vm7, %v1024_v20  ;;  %v999_v23 = vpop.xlane.xlu1 %998  ;;  %1090 = vperm.xlu0 %2272, %v1024_v20   ;;  %v1040_v50 = vsub.f32 %v2975_v16, %v1024_v20  ;;  %v989_v16 = vld [vmem:[#allocation3 + $0x68] sm:$0xff] }
 0x46e   : > { %v2990_v24 = vmax.f32 %v2981_v21, %v999_v23  ;;  %v995_v25 = vpop.xlane.xlu0 %994 }
 0x46f   : > { %v2993_v26 = vmax.f32 %v2986_v22, %v995_v25  ;;  %v1056_v57 = vmul.f32 1.442695, %v1040_v50 }
 0x470   : > { %1578 = vst.msk [vmem:[#allocation3 + $0x18] sm:$0xff] %vm1296_vm7, %v2990_v24  ;;  %1105 = vperm.xlu1 %2273, %v2990_v24   ;;  %v1043_v58 = vsub.f32 %v2981_v21, %v2990_v24 }
 0x471   : > { %1576 = vst.msk [vmem:[#allocation3 + $0x8] sm:$0xff] %vm1296_vm7, %v2993_v26  ;;  %v1041_v17 = vsub.f32 %v2986_v22, %v2993_v26  ;;  %2276 = vpow2.f32 %v1056_v57 }
 0x472   : > { %v1001_v29 = vpop.xlane.xlu0 %1000  ;;  %v1062_v21 = vmul.f32 1.442695, %v1043_v58 }
 0x473   : > { %v3005_v30 = vmax.f32 %v2998_v27, %v1001_v29  ;;  %v1007_v31 = vpop.xlane.xlu1 %1006 }
 0x474   : > { %v3008_v32 = vmax.f32 %v3002_v28, %v1007_v31  ;;  %1095 = vperm.xlu1 %2273, %v2993_v26   ;;  %v1042_v26 = vsub.f32 %v2973_v15, %v2978_v18  ;;  %v1058_v31 = vmul.f32 1.442695, %v1041_v17  ;;  %2278 = vpow2.f32 %v1062_v21 }
 0x475   : > { %1579 = vst.msk [vmem:[#allocation3 + $0x20] sm:$0xff] %vm1296_vm7, %v3005_v30 }
 0x476   : > { %1582 = vst.msk [vmem:[#allocation3 + $0x38] sm:$0xff] %vm1296_vm7, %v3008_v32  ;;  %v1005_v36 = vpop.xlane.xlu0 %1004  ;;  %v1047_v34 = vsub.f32 %v3002_v28, %v3008_v32  ;;  %2280 = vpow2.f32 %v1058_v31 }
 0x477   : > { %v3021_v37 = vmax.f32 %v3011_v33, %v1005_v36  ;;  %v1003_v38 = vpop.xlane.xlu1 %1002  ;;  %v1060_v36 = vmul.f32 1.442695, %v1042_v26 }
 0x478   : > { %v1029_v39 = vmax.f32 %v3016_v35, %v1003_v38  ;;  %v1044_v38 = vsub.f32 %v2998_v27, %v3005_v30 }
 0x479   : > { %1581 = vst.msk [vmem:[#allocation3 + $0x30] sm:$0xff] %vm1296_vm7, %v3021_v37  ;;  %1120 = vperm.xlu1 %2273, %v3021_v37  }
 0x47a   : > { %1580 = vst.msk [vmem:[#allocation3 + $0x28] sm:$0xff] %vm1296_vm7, %v1029_v39  ;;  %v1009_v42 = vpop.xlane.xlu0 %1008  ;;  %v1045_v23 = vsub.f32 %v3016_v35, %v1029_v39  ;;  %v1064_v28 = vmul.f32 1.442695, %v1044_v38 }
 0x47b   : > { %v1015_v43 = vpop.xlane.xlu1 %1014  ;;  %v3033_v44 = vmax.f32 %v3024_v40, %v1009_v42  ;;  %v3100_v18 = vpop.eup %2276 }
 0x47c   : > { %v3036_v45 = vmax.f32 %v3029_v41, %v1015_v43  ;;  %v1066_v35 = vmul.f32 1.442695, %v1045_v23 }
 0x47d   : > { %1583 = vst.msk [vmem:[#allocation3 + $0x40] sm:$0xff] %vm1296_vm7, %v3033_v44  ;;  %1110 = vperm.xlu1 %2273, %v3005_v30  }
 0x47e   : > { %1586 = vst.msk [vmem:[#allocation3 + $0x58] sm:$0xff] %vm1296_vm7, %v3036_v45  ;;  %v1013_v49 = vpop.xlane.xlu0 %1012  ;;  %2282 = vpow2.f32 %v1066_v35  ;;  %v1051_v15 = vsub.f32 %v3029_v41, %v3036_v45  ;;  %v3107_v42 = vpop.eup %2278 }
 0x47f   : > { %v1011_v51 = vpop.xlane.xlu1 %1010  ;;  %v3050_v52 = vmax.f32 %v3038_v46, %v1013_v49  ;;  %2284 = vpow2.f32 %v1060_v36 }
 0x480   : > { %v1033_v53 = vmax.f32 %v3044_v48, %v1011_v51  ;;  %v1078_v27 = vmul.f32 1.442695, %v1051_v15 }
 0x481   : > { %1585 = vst.msk [vmem:[#allocation3 + $0x50] sm:$0xff] %vm1296_vm7, %v3050_v52  ;;  %1115 = vperm.xlu1 %2273, %v1029_v39   ;;  %v1070_v39 = vmul.f32 1.442695, %v1047_v34  ;;  %v1050_v43 = vsub.f32 %v3038_v46, %v3050_v52 }
 0x482   : > { %1584 = vst.msk [vmem:[#allocation3 + $0x48] sm:$0xff] %vm1296_vm7, %v1033_v53  ;;  %1135 = vperm.xlu0 %2272, %v1033_v53   ;;  %v1017_v56 = vpop.xlane.xlu0 %1016  ;;  %v1049_v30 = vsub.f32 %v3044_v48, %v1033_v53  ;;  %v1048_v48 = vsub.f32 %v3024_v40, %v3033_v44 }
 0x483   : > { %v1023_v59 = vpop.xlane.xlu1 %1022  ;;  %v3063_v60 = vmax.f32 %v3053_v54, %v1017_v56  ;;  %2286 = vpow2.f32 %v1070_v39  ;;  %v1076_v49 = vmul.f32 1.442695, %v1050_v43 }
 0x484   : > { %v3066_v61 = vmax.f32 %v3057_v55, %v1023_v59  ;;  %2288 = vpow2.f32 %v1064_v28 }
 0x485   : > { %1587 = vst.msk [vmem:[#allocation3 + $0x60] sm:$0xff] %vm1296_vm7, %v3063_v60  ;;  %1125 = vperm.xlu1 %2273, %v3008_v32   ;;  %v1046_v32 = vsub.f32 %v3011_v33, %v3021_v37  ;;  %2290 = vpow2.f32 %v1078_v27  ;;  %v3113_v37 = vpop.eup %2280  ;;  %v1052_v53 = vsub.f32 %v3053_v54, %v3063_v60 }
 0x486   : > { %v1055_v19 = vsub.f32 %v3057_v55, %v3066_v61  ;;  %1590 = vst.msk [vmem:[#allocation3 + $0x78] sm:$0xff] %vm1296_vm7, %v3066_v61  ;;  %1145 = vperm.xlu0 %2272, %v3036_v45   ;;  %v1021_v20 = vpop.xlane.xlu0 %1020  ;;  %v1074_v45 = vmul.f32 1.442695, %v1049_v30 }
 0x487   : > { %v1019_v24 = vpop.xlane.xlu1 %1018  ;;  %v3082_v25 = vmax.f32 %v3068_v7, %v1021_v20  ;;  %v1068_v41 = vmul.f32 1.442695, %v1046_v32  ;;  %v1080_v56 = vmul.f32 1.442695, %v1052_v53 }
 0x488   : > { %v1037_v29 = vmax.f32 %v989_v16, %v1019_v24  ;;  %v3115_v47 = vpop.eup %2282 }
 0x489   : > { %v1054_v22 = vsub.f32 %v3068_v7, %v3082_v25  ;;  %1589 = vst.msk [vmem:[#allocation3 + $0x70] sm:$0xff] %vm1296_vm7, %v3082_v25  ;;  %1130 = vperm.xlu1 %2273, %v3033_v44   ;;  %2292 = vpow2.f32 %v1068_v41  ;;  %v3121_v50 = vpop.eup %2284 }
 0x48a   : > { %1588 = vst.msk [vmem:[#allocation3 + $0x68] sm:$0xff] %vm1296_vm7, %v1037_v29  ;;  %1155 = vperm.xlu0 %2272, %v1037_v29   ;;  %v1053_v33 = vsub.f32 %v989_v16, %v1037_v29  ;;  %2294 = vpow2.f32 %v1074_v45 }
 0x48b   : > { %2296 = vpow2.f32 %v1076_v49 }
 0x48c   : > { %v1082_v46 = vmul.f32 1.442695, %v1053_v33 }
 0x48d   : > { %1140 = vperm.xlu1 %2273, %v3050_v52   ;;  %v3123_v51 = vpop.eup %2286  ;;  %v1072_v52 = vmul.f32 1.442695, %v1048_v48 }
 0x48e   : > { %1165 = vperm.xlu0 %2272, %v3066_v61   ;;  %2298 = vpow2.f32 %v1082_v46  ;;  %v3129_v40 = vpop.eup %2288 }
 0x48f   : > { %v3131_v44 = vpop.eup %2290  ;;  %2300 = vpow2.f32 %v1072_v52 }
 0x490   : > { %2302 = vpow2.f32 %v1080_v56 }
 0x491   : > { %1150 = vperm.xlu1 %2273, %v3063_v60  }
 0x492   : > { %1448 = vperm.xlu0 %2272, %v3100_v18  }
 0x493   : > { %v3135_v57 = vpop.eup %2292 }
 0x494   : > { %v3137_v58 = vpop.eup %2294 }
 0x495   : > { %1160 = vperm.xlu1 %2273, %v3082_v25   ;;  %v3141_v54 = vpop.eup %2296 }
 0x496   : > { %1463 = vperm.xlu0 %2272, %v3107_v42  }
 0x498   : > { %v3143_v59 = vpop.eup %2298 }
 0x499   : > { %1453 = vperm.xlu1 %2273, %v3113_v37   ;;  %v3147_v60 = vpop.eup %2300 }
 0x49a   : > { %1473 = vperm.xlu0 %2272, %v3115_v47   ;;  %v3150_v16 = vpop.eup %2302 }
 0x49d   : > { %1458 = vperm.xlu1 %2273, %v3121_v50  }
 0x49e   : > { %1483 = vperm.xlu0 %2272, %v3123_v51  }
 0x4a1   : > { %1468 = vperm.xlu1 %2273, %v3129_v40  }
 0x4a2   : > { %1503 = vperm.xlu0 %2272, %v3131_v44  }
 0x4a5   : > { %1478 = vperm.xlu1 %2273, %v3135_v57  }
 0x4a6   : > { %1493 = vperm.xlu0 %2272, %v3137_v58  }
 0x4a9   : > { %1498 = vperm.xlu1 %2273, %v3141_v54  }
 0x4aa   : > { %1513 = vperm.xlu0 %2272, %v3143_v59  }
 0x4ad   : > { %1488 = vperm.xlu1 %2273, %v3147_v60  }
 0x4b1   : > { %1508 = vperm.xlu1 %2273, %v3150_v16  }
 0x4eb   : > { %v1101_v17 = vpop.permute.xlu1 %1100 }
 0x4ec   : > { %v1170_v20 = vsub.f32 %v2925_v62, %v1101_v17  ;;  %v1091_v21 = vpop.permute.xlu0 %1090 }
 0x4ed   : > { %v1168_v23 = vsub.f32 %v2928_v63, %v1091_v21 }
 0x4ee   : > { %v1188_v24 = vmul.f32 1.442695, %v1170_v20 }
 0x4ef   : > { %v1184_v29 = vmul.f32 1.442695, %v1168_v23  ;;  %v1106_v26 = vpop.permute.xlu1 %1105 }
 0x4f0   : > { %2304 = vpow2.f32 %v1188_v24  ;;  %v1171_v31 = vsub.f32 %v2931_v0, %v1106_v26 }
 0x4f1   : > { %2306 = vpow2.f32 %v1184_v29 }
 0x4f2   : > { %v1190_v34 = vmul.f32 1.442695, %v1171_v31 }
 0x4f3   : > { %v1096_v35 = vpop.permute.xlu1 %1095 }
 0x4f4   : > { %2308 = vpow2.f32 %v1190_v34  ;;  %v1169_v36 = vsub.f32 %v2933_v1, %v1096_v35 }
 0x4f6   : > { %v1186_v38 = vmul.f32 1.442695, %v1169_v36 }
 0x4f8   : > { %2310 = vpow2.f32 %v1186_v38  ;;  %v1121_v39 = vpop.permute.xlu1 %1120 }
 0x4f9   : > { %v1174_v62 = vsub.f32 %v2937_v2, %v1121_v39 }
 0x4fa   : > { %v2305_v15 = vpop.eup %2304 }
 0x4fb   : > { %v2307_v28 = vpop.eup %2306  ;;  %v1196_v63 = vmul.f32 1.442695, %v1174_v62  ;;  %1252 = vadd.xlane.f32.xlu0 %v2305_v15 }
 0x4fc   : > { %1248 = vadd.xlane.f32.xlu1 %v2307_v28  ;;  %v1111_v32 = vpop.permute.xlu1 %1110 }
 0x4fd   : > { %2312 = vpow2.f32 %v1196_v63  ;;  %v1172_v0 = vsub.f32 %v2939_v3, %v1111_v32 }
 0x4fe   : > { %v2309_v27 = vpop.eup %2308 }
 0x4ff   : > { %v1192_v30 = vmul.f32 1.442695, %v1172_v0  ;;  %v1314_v41 = vpack.c.bf16 %v2309_v27, %v2305_v15 }
 0x500   : > { %1254 = vadd.xlane.f32.xlu1 %v2309_v27  ;;  %v1116_v43 = vpop.permute.xlu1 %1115 }
 0x501   : > { %2314 = vpow2.f32 %v1192_v30  ;;  %v1173_v1 = vsub.f32 %v2945_v5, %v1116_v43  ;;  %v1136_v45 = vpop.permute.xlu0 %1135 }
 0x502   : > { %v2311_v33 = vpop.eup %2310  ;;  %v1177_v49 = vsub.f32 %v2957_v10, %v1136_v45 }
 0x503   : > { %v1194_v2 = vmul.f32 1.442695, %v1173_v1  ;;  %1250 = vadd.xlane.f32.xlu0 %v2311_v33  ;;  %v1313_v48 = vpack.c.bf16 %v2311_v33, %v2307_v28 }
 0x504   : > { %v1126_v46 = vpop.permute.xlu1 %1125  ;;  %v1202_v17 = vmul.f32 1.442695, %v1177_v49  ;;  %v1084_v49 = vmul.f32 1.442695, %v1054_v22 }
 0x505   : > { %2316 = vpow2.f32 %v1194_v2  ;;  %v1175_v52 = vsub.f32 %v2942_v4, %v1126_v46  ;;  %v1146_v3 = vpop.permute.xlu0 %1145  ;;  %2112 = vmatprep.mubr.bf16.mxu1 %v1313_v48  ;;  %v1086_v46 = vmul.f32 1.442695, %v1055_v19 }
 0x506   : > { %2113 = vmatmul.mubr.bf16.vlgmr.msra.gmra.mrb[0].mxu1 %v1314_v41  ;;  %v1179_v20 = vsub.f32 %v2953_v9, %v1146_v3 }
 0x507   : > { %v2313_v53 = vpop.eup %2312  ;;  %v1198_v56 = vmul.f32 1.442695, %v1175_v52 }
 0x508   : > { %1260 = vadd.xlane.f32.xlu0 %v2313_v53  ;;  %v1131_v5 = vpop.permute.xlu1 %1130  ;;  %v1206_v29 = vmul.f32 1.442695, %v1179_v20 }
 0x509   : > { %2318 = vpow2.f32 %v1198_v56  ;;  %v1176_v21 = vsub.f32 %v2951_v8, %v1131_v5  ;;  %v1156_v23 = vpop.permute.xlu0 %1155 }
 0x50a   : > { %2320 = vpow2.f32 %v1202_v17  ;;  %v1181_v4 = vsub.f32 %v2969_v14, %v1156_v23 }
 0x50b   : > { %v2315_v24 = vpop.eup %2314  ;;  %v1200_v10 = vmul.f32 1.442695, %v1176_v21 }
 0x50c   : > { %1256 = vadd.xlane.f32.xlu0 %v2315_v24  ;;  %v1141_v26 = vpop.permute.xlu1 %1140  ;;  %v1210_v36 = vmul.f32 1.442695, %v1181_v4 }
 0x50d   : > { %2322 = vpow2.f32 %v1200_v10  ;;  %v1178_v31 = vsub.f32 %v2949_v6, %v1141_v26  ;;  %v1166_v34 = vpop.permute.xlu0 %1165 }
 0x50e   : > { %2324 = vpow2.f32 %v1206_v29  ;;  %v1183_v38 = vsub.f32 %v2965_v13, %v1166_v34  ;;  %v1216_v29 = vld [vmem:[#allocation4] sm:$0xff] }
 0x50f   : > { %v2317_v35 = vpop.eup %2316  ;;  %v1204_v9 = vmul.f32 1.442695, %v1178_v31  ;;  %v1232_v31 = vmul.f32 %v3100_v18, %v1216_v29  ;;  %v1222_v18 = vld [vmem:[#allocation4 + $0x30] sm:$0xff] }
 0x510   : > { %v1151_v8 = vpop.permute.xlu1 %1150  ;;  %v1315_v39 = vpack.c.bf16 %v2317_v35, %v2315_v24  ;;  %v1214_v28 = vmul.f32 1.442695, %v1183_v38  ;;  %v1218_v24 = vld [vmem:[#allocation4 + $0x10] sm:$0xff] }
 0x511   : > { %2326 = vpow2.f32 %v1204_v9  ;;  %v1180_v62 = vsub.f32 %v2963_v12, %v1151_v8  ;;  %v1234_v4 = vmul.f32 %v3121_v50, %v1218_v24  ;;  %v1219_v9 = vld [vmem:[#allocation4 + $0x18] sm:$0xff]  ;;  %v1217_v8 = vld [vmem:[#allocation4 + $0x8] sm:$0xff] }
 0x512   : > { %2116 = vmatprep.mubr.bf16.mxu1 %v1315_v39  ;;  %2328 = vpow2.f32 %v1210_v36  ;;  %v1235_v38 = vmul.f32 %v3107_v42, %v1219_v9 }
 0x513   : > { %v2319_v15 = vpop.eup %2318  ;;  %v1208_v14 = vmul.f32 1.442695, %v1180_v62 }
 0x514   : > { %1262 = vadd.xlane.f32.xlu1 %v2319_v15  ;;  %v1161_v63 = vpop.permute.xlu1 %1160  ;;  %v1316_v6 = vpack.c.bf16 %v2319_v15, %v2313_v53  ;;  %v2321_v0 = vpop.eup %2320  ;;  %v1233_v15 = vmul.f32 %v3113_v37, %v1217_v8  ;;  %v1223_v37 = vld [vmem:[#allocation4 + $0x38] sm:$0xff]  ;;  %v1228_v8 = vld [vmem:[#allocation4 + $0x60] sm:$0xff] }
 0x515   : > { %2330 = vpow2.f32 %v1208_v14  ;;  %v1182_v32 = vsub.f32 %v2961_v11, %v1161_v63  ;;  %v3181_v53 = vpop.permute.xlu0 %1448 }
 0x516   : > { %2117 = vmatmul.mubr.bf16.gmra.mrb[4].mxu1 %v1316_v6  ;;  %2332 = vpow2.f32 %v1214_v28  ;;  %v1238_v28 = vmul.f32 %v3135_v57, %v1222_v18  ;;  %v1220_v6 = vld [vmem:[#allocation4 + $0x20] sm:$0xff] }
 0x517   : > { %v2323_v27 = vpop.eup %2322  ;;  %v1212_v13 = vmul.f32 1.442695, %v1182_v32  ;;  %v1236_v42 = vmul.f32 %v3129_v40, %v1220_v6  ;;  %v1431_v6 = vld [vmem:[#allocation5 + $0x8] sm:$0xff] }
 0x518   : > { %1258 = vadd.xlane.f32.xlu1 %v2317_v35  ;;  %v1317_v30 = vpack.c.bf16 %v2321_v0, %v2323_v27  ;;  %v2325_v12 = vpop.eup %2324  ;;  %v3183_v56 = vpop.permute.xlu1 %1453 }
 0x519   : > { %2334 = vpow2.f32 %v1212_v13  ;;  %v3185_v7 = vpop.permute.xlu0 %1463  ;;  %v1239_v13 = vmul.f32 %v3123_v51, %v1223_v37  ;;  %v1224_v51 = vld [vmem:[#allocation4 + $0x40] sm:$0xff]  ;;  %v1527_v37 = vmul.f32 %v3183_v56, %v1431_v6 }
 0x51a   : > { %2120 = vmatprep.mubr.bf16.mxu1 %v1317_v30  ;;  %2336 = vpow2.f32 %v1084_v49  ;;  %v1225_v49 = vld [vmem:[#allocation4 + $0x48] sm:$0xff] }
 0x51b   : > { %v2327_v41 = vpop.eup %2326  ;;  %2338 = vpow2.f32 %v1086_v46  ;;  %v1241_v29 = vmul.f32 %v3137_v58, %v1225_v49 }
 0x51c   : > { %1270 = vadd.xlane.f32.xlu1 %v2325_v12  ;;  %1268 = vadd.xlane.f32.xlu0 %v2327_v41  ;;  %v1318_v43 = vpack.c.bf16 %v2325_v12, %v2327_v41  ;;  %v2329_v1 = vpop.eup %2328  ;;  %v3187_v25 = vpop.permute.xlu1 %1458  ;;  %v1221_v12 = vld [vmem:[#allocation4 + $0x28] sm:$0xff] }
 0x51d   : > { %v3189_v22 = vpop.permute.xlu0 %1473  ;;  %v1237_v57 = vmul.f32 %v3115_v47, %v1221_v12  ;;  %v1240_v47 = vmul.f32 %v3147_v60, %v1224_v51  ;;  %v1229_v60 = vld [vmem:[#allocation4 + $0x68] sm:$0xff] }
 0x51e   : > { %2121 = vmatmul.mubr.bf16.gmra.mrb[8].mxu1 %v1318_v43 }
 0x51f   : > { %v2331_v45 = vpop.eup %2330 }
 0x520   : > { %1266 = vadd.xlane.f32.xlu1 %v2321_v0  ;;  %1264 = vadd.xlane.f32.xlu0 %v2323_v27  ;;  %v1319_v11 = vpack.c.bf16 %v2329_v1, %v2331_v45  ;;  %v2333_v33 = vpop.eup %2332  ;;  %v3191_v55 = vpop.permute.xlu1 %1468 }
 0x521   : > { %v3193_v61 = vpop.permute.xlu0 %1483 }
 0x522   : > { %2124 = vmatprep.mubr.bf16.mxu1 %v1319_v11 }
 0x523   : > { %v2335_v2 = vpop.eup %2334 }
 0x524   : > { %1278 = vadd.xlane.f32.xlu1 %v2333_v33  ;;  %1276 = vadd.xlane.f32.xlu0 %v2335_v2  ;;  %v1320_v48 = vpack.c.bf16 %v2333_v33, %v2335_v2  ;;  %v3175_v52 = vpop.eup %2336  ;;  %v3195_v19 = vpop.permute.xlu1 %1478 }
 0x525   : > { %v3178_v3 = vpop.eup %2338  ;;  %v3197_v17 = vpop.permute.xlu0 %1503 }
 0x526   : > { %2125 = vmatmul.mubr.bf16.gmra.mrb[12].mxu1 %v1320_v48 }
 0x528   : > { %1274 = vadd.xlane.f32.xlu1 %v2329_v1  ;;  %1272 = vadd.xlane.f32.xlu0 %v2331_v45  ;;  %v3199_v20 = vpop.permute.xlu1 %1498  ;;  %v1226_v1 = vld [vmem:[#allocation4 + $0x50] sm:$0xff]  ;;  %v1227_v45 = vld [vmem:[#allocation4 + $0x58] sm:$0xff] }
 0x529   : > { %v3201_v5 = vpop.permute.xlu0 %1493  ;;  %v1242_v40 = vmul.f32 %v3141_v54, %v1226_v1  ;;  %v1243_v33 = vmul.f32 %v3131_v44, %v1227_v45  ;;  %v1231_v54 = vld [vmem:[#allocation4 + $0x78] sm:$0xff] }
 0x52a   : > { %v1247_v9 = vmul.f32 %v3178_v3, %v1231_v54 }
 0x52c   : > { %v3203_v21 = vpop.permute.xlu1 %1488 }
 0x52d   : > { %v3205_v23 = vpop.permute.xlu0 %1513 }
 0x530   : > { %v3207_v10 = vpop.permute.xlu1 %1508 }
 0x539   : > { %1518 = vperm.xlu1 %2273, %v3175_v52  }
 0x53e   : > { %1523 = vperm.xlu0 %2272, %v3178_v3   ;;  %v1432_v3 = vld [vmem:[#allocation5 + $0x10] sm:$0xff] }
 0x588   : > { %v1253_v26 = vpop.xlane.xlu0 %1252 }
 0x589   : > { %v1282_v34 = vadd.f32 %v1253_v26, %v1234_v4  ;;  %v1249_v35 = vpop.xlane.xlu1 %1248 }
 0x58a   : > { %v1280_v36 = vadd.f32 %v1249_v35, %v1232_v31  ;;  %v1230_v31 = vld [vmem:[#allocation4 + $0x70] sm:$0xff] }
 0x58b   : > { %1299 = vst.msk [vmem:[#allocation4 + $0x10] sm:$0xff] %vm1296_vm7, %v1282_v34  ;;  %v1246_v35 = vmul.f32 %v3175_v52, %v1230_v31 }
 0x58c   : > { %1297 = vst.msk [vmem:[#allocation4] sm:$0xff] %vm1296_vm7, %v1280_v36 }
 0x58d   : > { %v1255_v39 = vpop.xlane.xlu1 %1254 }
 0x58e   : > { %v1283_v62 = vadd.f32 %v1255_v39, %v1235_v38 }
 0x590   : > { %1300 = vst.msk [vmem:[#allocation4 + $0x18] sm:$0xff] %vm1296_vm7, %v1283_v62  ;;  %v1251_v50 = vpop.xlane.xlu0 %1250  ;;  %v1244_v62 = vmul.f32 %v3150_v16, %v1228_v8 }
 0x591   : > { %v1281_v14 = vadd.f32 %v1251_v50, %v1233_v15  ;;  %v1245_v15 = vmul.f32 %v3143_v59, %v1229_v60  ;;  %v1442_v60 = vld [vmem:[#allocation5 + $0x60] sm:$0xff] }
 0x593   : > { %1298 = vst.msk [vmem:[#allocation4 + $0x8] sm:$0xff] %vm1296_vm7, %v1281_v14 }
 0x595   : > { %v1261_v63 = vpop.xlane.xlu0 %1260 }
 0x596   : > { %v1286_v32 = vadd.f32 %v1261_v63, %v1238_v28  ;;  %v1430_v28 = vld [vmem:[#allocation5] sm:$0xff]  ;;  %v1433_v63 = vld [vmem:[#allocation5 + $0x18] sm:$0xff] }
 0x597   : > { %v1529_v59 = vmul.f32 %v3185_v7, %v1433_v63  ;;  %v1437_v7 = vld [vmem:[#allocation5 + $0x38] sm:$0xff] }
 0x598   : > { %1303 = vst.msk [vmem:[#allocation4 + $0x30] sm:$0xff] %vm1296_vm7, %v1286_v32  ;;  %v1528_v32 = vmul.f32 %v3187_v25, %v1432_v3  ;;  %v1434_v25 = vld [vmem:[#allocation5 + $0x20] sm:$0xff] }
 0x599   : > { %v1257_v0 = vpop.xlane.xlu0 %1256  ;;  %v1530_v56 = vmul.f32 %v3191_v55, %v1434_v25  ;;  %v1441_v55 = vld [vmem:[#allocation5 + $0x58] sm:$0xff] }
 0x59a   : > { %v1284_v27 = vadd.f32 %v1257_v0, %v1236_v42  ;;  %v1526_v42 = vmul.f32 %v3181_v53, %v1430_v28  ;;  %v1436_v53 = vld [vmem:[#allocation5 + $0x30] sm:$0xff] }
 0x59b   : > { %v1532_v1 = vmul.f32 %v3195_v19, %v1436_v53  ;;  %v1438_v19 = vld [vmem:[#allocation5 + $0x40] sm:$0xff] }
 0x59c   : > { %1301 = vst.msk [vmem:[#allocation4 + $0x20] sm:$0xff] %vm1296_vm7, %v1284_v27 }
 0x5a1   : > { %v1263_v30 = vpop.xlane.xlu1 %1262 }
 0x5a2   : > { %v1287_v41 = vadd.f32 %v1263_v30, %v1239_v13 }
 0x5a4   : > { %1304 = vst.msk [vmem:[#allocation4 + $0x38] sm:$0xff] %vm1296_vm7, %v1287_v41 }
 0x5a5   : > { %v1259_v43 = vpop.xlane.xlu1 %1258 }
 0x5a6   : > { %v1285_v11 = vadd.f32 %v1259_v43, %v1237_v57  ;;  %v1435_v43 = vld [vmem:[#allocation5 + $0x28] sm:$0xff] }
 0x5a8   : > { %1302 = vst.msk [vmem:[#allocation4 + $0x28] sm:$0xff] %vm1296_vm7, %v1285_v11  ;;  %v1533_v11 = vmul.f32 %v3193_v61, %v1437_v7  ;;  %v1439_v61 = vld [vmem:[#allocation5 + $0x48] sm:$0xff] }
 0x5a9   : > { %v1269_v2 = vpop.xlane.xlu0 %1268  ;;  %v1271_v48 = vpop.xlane.xlu1 %1270 }
 0x5aa   : > { %v1290_v46 = vadd.f32 %v1269_v2, %v1242_v40  ;;  %v1291_v24 = vadd.f32 %v1271_v48, %v1243_v33  ;;  %v1531_v2 = vmul.f32 %v3189_v22, %v1435_v43  ;;  %v1534_v22 = vmul.f32 %v3203_v21, %v1438_v19  ;;  %v1445_v21 = vld [vmem:[#allocation5 + $0x78] sm:$0xff] }
 0x5ac   : > { %1307 = vst.msk [vmem:[#allocation4 + $0x50] sm:$0xff] %vm1296_vm7, %v1290_v46  ;;  %1308 = vst.msk [vmem:[#allocation4 + $0x58] sm:$0xff] %vm1296_vm7, %v1291_v24  ;;  %v1440_v24 = vld [vmem:[#allocation5 + $0x50] sm:$0xff] }
 0x5ad   : > { %v1265_v4 = vpop.xlane.xlu0 %1264  ;;  %v1267_v26 = vpop.xlane.xlu1 %1266 }
 0x5ae   : > { %v1288_v34 = vadd.f32 %v1265_v4, %v1240_v47  ;;  %v1289_v44 = vadd.f32 %v1267_v26, %v1241_v29  ;;  %v1536_v29 = vmul.f32 %v3199_v20, %v1440_v24  ;;  %v1537_v26 = vmul.f32 %v3197_v17, %v1441_v55 }
 0x5b0   : > { %1305 = vst.msk [vmem:[#allocation4 + $0x40] sm:$0xff] %vm1296_vm7, %v1288_v34  ;;  %1306 = vst.msk [vmem:[#allocation4 + $0x48] sm:$0xff] %vm1296_vm7, %v1289_v44  ;;  %v1535_v34 = vmul.f32 %v3201_v5, %v1439_v61 }
 0x5b1   : > { %v1277_v36 = vpop.xlane.xlu0 %1276  ;;  %v1279_v38 = vpop.xlane.xlu1 %1278 }
 0x5b2   : > { %v1294_v39 = vadd.f32 %v1277_v36, %v1246_v35  ;;  %v1295_v58 = vadd.f32 %v1279_v38, %v1247_v9  ;;  %v1444_v38 = vld [vmem:[#allocation5 + $0x70] sm:$0xff] }
 0x5b3   : > { %v1622_v25 = vld [vmem:[#allocation4 + $0x58] sm:$0xff] (!%p1978_p6)  ;;  %v1621_v43 = vld [vmem:[#allocation4 + $0x50] sm:$0xff] (!%p1978_p6) }
 0x5b4   : > { %1311 = vst.msk [vmem:[#allocation4 + $0x70] sm:$0xff] %vm1296_vm7, %v1294_v39  ;;  %1312 = vst.msk [vmem:[#allocation4 + $0x78] sm:$0xff] %vm1296_vm7, %v1295_v58  ;;  %v1443_v39 = vld [vmem:[#allocation5 + $0x68] sm:$0xff]  ;;  %v1538_v58 = vmul.f32 %v3207_v10, %v1442_v60  ;;  %v1613_v10 = vld [vmem:[#allocation4 + $0x10] sm:$0xff] (!%p1978_p6) }
 0x5b5   : > { %v1273_v50 = vpop.xlane.xlu0 %1272  ;;  %v1275_v14 = vpop.xlane.xlu1 %1274  ;;  %2342 = vrcp.f32 (!%p1978_p6), %v1613_v10 }
 0x5b6   : > { %v1292_v18 = vadd.f32 %v1273_v50, %v1244_v62  ;;  %v1293_v52 = vadd.f32 %v1275_v14, %v1245_v15 }
 0x5b8   : > { %1309 = vst.msk [vmem:[#allocation4 + $0x60] sm:$0xff] %vm1296_vm7, %v1292_v18  ;;  %1310 = vst.msk [vmem:[#allocation4 + $0x68] sm:$0xff] %vm1296_vm7, %v1293_v52  ;;  %v1539_v18 = vmul.f32 %v3205_v23, %v1443_v39  ;;  %v2552_v23 = vmov (!%p1978_p6), 0  }
 0x5b9   : > { %v1519_v8 = vpop.permute.xlu1 %1518  ;;  %2341 = vset.pattern.permute.xlu1 (!%p1978_p6), %v2552_v23  ;;  %2340 = vset.pattern.permute.xlu0 (!%p1978_p6), %v2552_v23 }
 0x5ba   : > { %v1540_v5 = vmul.f32 %v1519_v8, %v1444_v38 }
 0x5bd   : > { %v1524_v17 = vpop.permute.xlu0 %1523 }
 0x5be   : > { %v1541_v15 = vmul.f32 %v1524_v17, %v1445_v21 }
 0x5d9   : > { %v2114_v0 = vpop.f32.mrb[0].mxu1 }
 0x5da   : > { %v1544_v16 = vadd.f32 %v2114_v0, %v1528_v32  ;;  %v1367_v27 = vpop.f32.mrb[1].mxu1  ;;  %v1611_v32 = vld [vmem:[#allocation4] sm:$0xff] (!%p1978_p6)  ;;  %v1612_v0 = vld [vmem:[#allocation4 + $0x8] sm:$0xff] (!%p1978_p6) }
 0x5db   : > { %v1542_v13 = vadd.f32 %v1526_v42, %v1367_v27  ;;  %v2115_v30 = vpop.f32.mrb[2].mxu1  ;;  %v1614_v42 = vld [vmem:[#allocation4 + $0x18] sm:$0xff] (!%p1978_p6)  ;;  %2344 = vrcp.f32 (!%p1978_p6), %v1611_v32 }
 0x5dc   : > { %1561 = vst.msk [vmem:[#allocation5 + $0x10] sm:$0xff] %vm1558_vm8, %v1544_v16  ;;  %v1545_v12 = vadd.f32 %v2115_v30, %v1529_v59  ;;  %v1370_v41 = vpop.f32.mrb[3].mxu1  ;;  %2346 = vrcp.f32 (!%p1978_p6), %v1614_v42  ;;  %v1616_v59 = vld [vmem:[#allocation4 + $0x28] sm:$0xff] (!%p1978_p6)  ;;  %v1615_v16 = vld [vmem:[#allocation4 + $0x20] sm:$0xff] (!%p1978_p6)  ;;  %v1618_v27 = vld [vmem:[#allocation4 + $0x38] sm:$0xff] (!%p1978_p6) }
 0x5dd   : > { %1559 = vst.msk [vmem:[#allocation5] sm:$0xff] %vm1558_vm8, %v1542_v13  ;;  %v1543_v57 = vadd.f32 %v1527_v37, %v1370_v41  ;;  %2348 = vrcp.f32 (!%p1978_p6), %v1612_v0  ;;  %v1617_v37 = vld [vmem:[#allocation4 + $0x30] sm:$0xff] (!%p1978_p6)  ;;  %v2343_v13 = vpop.eup (!%p1978_p6), %2342 }
 0x5de   : > { %1562 = vst.msk [vmem:[#allocation5 + $0x18] sm:$0xff] %vm1558_vm8, %v1545_v12  ;;  %2350 = vrcp.f32 (!%p1978_p6), %v1616_v59  ;;  %1655 = vperm.xlu1 (!%p1978_p6), %2341, %v2343_v13   ;;  %v1620_v12 = vld [vmem:[#allocation4 + $0x48] sm:$0xff] (!%p1978_p6) }
 0x5df   : > { %1560 = vst.msk [vmem:[#allocation5 + $0x8] sm:$0xff] %vm1558_vm8, %v1543_v57  ;;  %2352 = vrcp.f32 (!%p1978_p6), %v1615_v16  ;;  %v1619_v57 = vld [vmem:[#allocation4 + $0x40] sm:$0xff] (!%p1978_p6) }
 0x5e0   : > { %2354 = vrcp.f32 (!%p1978_p6), %v1618_v27 }
 0x5e1   : > { %2356 = vrcp.f32 (!%p1978_p6), %v1617_v37 }
 0x5e2   : > { %2358 = vrcp.f32 (!%p1978_p6), %v1620_v12 }
 0x5e3   : > { %2360 = vrcp.f32 (!%p1978_p6), %v1619_v57 }
 0x5e4   : > { %2362 = vrcp.f32 (!%p1978_p6), %v1622_v25  ;;  %v1595_v61 = vld [vmem:[#allocation5] sm:$0xff] (!%p1978_p6) }
 0x5e5   : > { %v2345_v30 = vpop.eup (!%p1978_p6), %2344  ;;  %2364 = vrcp.f32 (!%p1978_p6), %v1621_v43  ;;  %v2010_v43 = vld [vmem:[%s2790_s24] sm:$0xff] (!%p1978_p6)  }
 0x5e6   : > { %v2347_v41 = vpop.eup (!%p1978_p6), %2346  ;;  %1645 = vperm.xlu0 (!%p1978_p6), %2340, %v2345_v30  }
 0x5e7   : > { %v2349_v53 = vpop.eup (!%p1978_p6), %2348  ;;  %1660 = vperm.xlu1 (!%p1978_p6), %2341, %v2347_v41  }
 0x5e8   : > { %v2351_v7 = vpop.eup (!%p1978_p6), %2350 }
 0x5e9   : > { %v2118_v45 = vpop.f32.mrb[4].mxu1 }
 0x5ea   : > { %v1548_v40 = vadd.f32 %v2118_v45, %v1532_v1  ;;  %v1383_v33 = vpop.f32.mrb[5].mxu1  ;;  %1650 = vperm.xlu0 (!%p1978_p6), %2340, %v2349_v53   ;;  %v2353_v1 = vpop.eup (!%p1978_p6), %2352 }
 0x5eb   : > { %v1546_v48 = vadd.f32 %v1530_v56, %v1383_v33  ;;  %v2119_v51 = vpop.f32.mrb[6].mxu1  ;;  %1670 = vperm.xlu1 (!%p1978_p6), %2341, %v2351_v7   ;;  %v1624_v56 = vld [vmem:[#allocation4 + $0x68] sm:$0xff] (!%p1978_p6)  ;;  %v2355_v45 = vpop.eup (!%p1978_p6), %2354  ;;  %v1626_v33 = vld [vmem:[#allocation4 + $0x78] sm:$0xff] (!%p1978_p6) }
 0x5ec   : > { %1565 = vst.msk [vmem:[#allocation5 + $0x30] sm:$0xff] %vm1558_vm8, %v1548_v40  ;;  %v1549_v49 = vadd.f32 %v2119_v51, %v1533_v11  ;;  %v1386_v46 = vpop.f32.mrb[7].mxu1  ;;  %v1623_v11 = vld [vmem:[#allocation4 + $0x60] sm:$0xff] (!%p1978_p6)  ;;  %v2357_v40 = vpop.eup (!%p1978_p6), %2356  ;;  %2366 = vrcp.f32 (!%p1978_p6), %v1624_v56  ;;  %v2011_v56 = vunpack.c.l.bf16 (!%p1978_p6), %v2010_v43 }
 0x5ed   : > { %1563 = vst.msk [vmem:[#allocation5 + $0x20] sm:$0xff] %vm1558_vm8, %v1546_v48  ;;  %v1547_v47 = vadd.f32 %v1531_v2, %v1386_v46  ;;  %2368 = vrcp.f32 (!%p1978_p6), %v1623_v11  ;;  %v2359_v2 = vpop.eup (!%p1978_p6), %2358  ;;  %v1625_v48 = vld [vmem:[#allocation4 + $0x70] sm:$0xff] (!%p1978_p6) }
 0x5ee   : > { %1566 = vst.msk [vmem:[#allocation5 + $0x38] sm:$0xff] %vm1558_vm8, %v1549_v49  ;;  %1665 = vperm.xlu0 (!%p1978_p6), %2340, %v2353_v1   ;;  %v2361_v51 = vpop.eup (!%p1978_p6), %2360  ;;  %2370 = vrcp.f32 (!%p1978_p6), %v1626_v33  ;;  %v1772_v1 = vstv (!%p1978_p6), %s1739_s9  ;;  %v2012_v33 = vunpack.c.h.bf16 (!%p1978_p6), %v2010_v43 }
 0x5ef   : > { %1564 = vst.msk [vmem:[#allocation5 + $0x28] sm:$0xff] %vm1558_vm8, %v1547_v47  ;;  %1680 = vperm.xlu1 (!%p1978_p6), %2341, %v2355_v45   ;;  %2372 = vrcp.f32 (!%p1978_p6), %v1625_v48  ;;  %v2363_v49 = vpop.eup (!%p1978_p6), %2362  ;;  %v2019_v48 = vld [vmem:[%s2790_s24 + $0x8] sm:$0xff] (!%p1978_p6)  }
 0x5f0   : > { %v2365_v46 = vpop.eup (!%p1978_p6), %2364 }
 0x5f1   : > { %v2122_v4 = vpop.f32.mrb[8].mxu1 }
 0x5f2   : > { %v1552_v31 = vadd.f32 %v2122_v4, %v1536_v29  ;;  %v1399_v54 = vpop.f32.mrb[9].mxu1  ;;  %1675 = vperm.xlu0 (!%p1978_p6), %2340, %v2357_v40   ;;  %v1596_v4 = vld [vmem:[#allocation5 + $0x8] sm:$0xff] (!%p1978_p6) }
 0x5f3   : > { %v1550_v44 = vadd.f32 %v1534_v22, %v1399_v54  ;;  %v2123_v35 = vpop.f32.mrb[10].mxu1  ;;  %1690 = vperm.xlu1 (!%p1978_p6), %2341, %v2359_v2  }
 0x5f4   : > { %1569 = vst.msk [vmem:[#allocation5 + $0x50] sm:$0xff] %vm1558_vm8, %v1552_v31  ;;  %v1553_v9 = vadd.f32 %v2123_v35, %v1537_v26  ;;  %v1402_v36 = vpop.f32.mrb[11].mxu1  ;;  %v1597_v26 = vld [vmem:[#allocation5 + $0x10] sm:$0xff] (!%p1978_p6)  ;;  %v1598_v35 = vld [vmem:[#allocation5 + $0x18] sm:$0xff] (!%p1978_p6)  ;;  %v1599_v8 = vld [vmem:[#allocation5 + $0x20] sm:$0xff] (!%p1978_p6) }
 0x5f5   : > { %1567 = vst.msk [vmem:[#allocation5 + $0x40] sm:$0xff] %vm1558_vm8, %v1550_v44  ;;  %v1551_v20 = vadd.f32 %v1535_v34, %v1402_v36 }
 0x5f6   : > { %1570 = vst.msk [vmem:[#allocation5 + $0x58] sm:$0xff] %vm1558_vm8, %v1553_v9  ;;  %1685 = vperm.xlu0 (!%p1978_p6), %2340, %v2361_v51   ;;  %v2367_v24 = vpop.eup (!%p1978_p6), %2366  ;;  %v1600_v21 = vld [vmem:[#allocation5 + $0x28] sm:$0xff] (!%p1978_p6) }
 0x5f7   : > { %1568 = vst.msk [vmem:[#allocation5 + $0x48] sm:$0xff] %vm1558_vm8, %v1551_v20  ;;  %1700 = vperm.xlu1 (!%p1978_p6), %2341, %v2363_v49   ;;  %v2369_v47 = vpop.eup (!%p1978_p6), %2368 }
 0x5f8   : > { %v2371_v19 = vpop.eup (!%p1978_p6), %2370 }
 0x5f9   : > { %v2126_v62 = vpop.f32.mrb[12].mxu1  ;;  %1594 = sbr.rel (%p1978_p6) target bundleno = 1786 (0x6fa), region = 105  ;;  %v2373_v55 = vpop.eup (!%p1978_p6), %2372 }
 0x5fa   : > { %v1556_v50 = vadd.f32 %v2126_v62, %v1540_v5  ;;  %v1415_v14 = vpop.f32.mrb[13].mxu1  ;;  %1695 = vperm.xlu0 (!%p1978_p6), %2340, %v2365_v46   ;;  %v1601_v5 = vld [vmem:[#allocation5 + $0x30] sm:$0xff] (!%p1978_p6)  ;;  %v2015_v46 = vunpack.c.l.bf16 (!%p1978_p6), %v2019_v48 }
 0x5fb   : > { %v1554_v52 = vadd.f32 %v1538_v58, %v1415_v14  ;;  %v2127_v3 = vpop.f32.mrb[14].mxu1  ;;  %1710 = vperm.xlu1 (!%p1978_p6), %2341, %v2367_v24   ;;  %v1605_v10 = vld [vmem:[#allocation5 + $0x50] sm:$0xff] (!%p1978_p6) }
 0x5fc   : > { %1573 = vst.msk [vmem:[#allocation5 + $0x70] sm:$0xff] %vm1558_vm8, %v1556_v50  ;;  %v1557_v28 = vadd.f32 %v2127_v3, %v1541_v15  ;;  %v1418_v63 = vpop.f32.mrb[15].mxu1  ;;  %v1602_v15 = vld [vmem:[#allocation5 + $0x38] sm:$0xff] (!%p1978_p6) }
 0x5fd   : > { %1571 = vst.msk [vmem:[#allocation5 + $0x60] sm:$0xff] %vm1558_vm8, %v1554_v52  ;;  %v1555_v6 = vadd.f32 %v1539_v18, %v1418_v63  ;;  %v1603_v18 = vld [vmem:[#allocation5 + $0x40] sm:$0xff] (!%p1978_p6)  ;;  %v1606_v23 = vld [vmem:[#allocation5 + $0x58] sm:$0xff] (!%p1978_p6) }
 0x5fe   : > { %1574 = vst.msk [vmem:[#allocation5 + $0x78] sm:$0xff] %vm1558_vm8, %v1557_v28  ;;  %1705 = vperm.xlu0 (!%p1978_p6), %2340, %v2369_v47   ;;  %v1604_v28 = vld [vmem:[#allocation5 + $0x48] sm:$0xff] (!%p1978_p6) }
 0x5ff   : > { %1572 = vst.msk [vmem:[#allocation5 + $0x68] sm:$0xff] %vm1558_vm8, %v1555_v6  ;;  %1720 = vperm.xlu1 (!%p1978_p6), %2341, %v2371_v19  }
 0x602   : > { %1715 = vperm.xlu0 %2340, %v2373_v55   ;;  %v2016_v55 = vunpack.c.h.bf16 %v2019_v48 }
 0x603   : > { %v1609_v41 = vld [vmem:[#allocation5 + $0x70] sm:$0xff] }
 0x604   : > { %v1607_v16 = vld [vmem:[#allocation5 + $0x60] sm:$0xff] }
 0x605   : > { %v1610_v25 = vld [vmem:[#allocation5 + $0x78] sm:$0xff] }
 0x606   : > { %v1608_v13 = vld [vmem:[#allocation5 + $0x68] sm:$0xff] }
 0x65d   : > { %v1656_v34 = vpop.permute.xlu1 %1655 }
 0x65e   : > { %v1725_v44 = vmul.f32 %v1656_v34, %v1597_v26 }
 0x665   : > { %v1646_v29 = vpop.permute.xlu0 %1645 }
 0x666   : > { %v1723_v22 = vmul.f32 %v1646_v29, %v1595_v61  ;;  %v1661_v9 = vpop.permute.xlu1 %1660 }
 0x667   : > { %v1726_v36 = vmul.f32 %v1661_v9, %v1598_v35 }
 0x668   : > { %1740 = vxpose.xlu0.b32.start [1/16] (narrow) %v1723_v22, 32 }
 0x669   : > { %v1651_v31 = vpop.permute.xlu0 %1650 }
 0x66a   : > { %v1724_v54 = vmul.f32 %v1651_v31, %v1596_v4  ;;  %v1671_v60 = vpop.permute.xlu1 %1670 }
 0x66b   : > { %v1728_v17 = vmul.f32 %v1671_v60, %v1600_v21 }
 0x66c   : > { %1741 = vxpose.xlu0.b32.cont [2/16] (narrow) %v1724_v54, 32 }
 0x66d   : > { %v1666_v38 = vpop.permute.xlu0 %1665 }
 0x66e   : > { %v1727_v20 = vmul.f32 %v1666_v38, %v1599_v8  ;;  %v1681_v62 = vpop.permute.xlu1 %1680 }
 0x66f   : > { %v1730_v50 = vmul.f32 %v1681_v62, %v1602_v15 }
 0x670   : > { %1742 = vxpose.xlu0.b32.cont [3/16] (narrow) %v1725_v44, 32 }
 0x671   : > { %v1676_v39 = vpop.permute.xlu0 %1675 }
 0x672   : > { %v1729_v58 = vmul.f32 %v1676_v39, %v1601_v5  ;;  %v1691_v3 = vpop.permute.xlu1 %1690 }
 0x673   : > { %v1732_v63 = vmul.f32 %v1691_v3, %v1604_v28 }
 0x674   : > { %1743 = vxpose.xlu0.b32.cont [4/16] (narrow) %v1726_v36, 32 }
 0x675   : > { %v1686_v14 = vpop.permute.xlu0 %1685 }
 0x676   : > { %v1731_v52 = vmul.f32 %v1686_v14, %v1603_v18  ;;  %v1701_v42 = vpop.permute.xlu1 %1700 }
 0x677   : > { %v1734_v0 = vmul.f32 %v1701_v42, %v1606_v23 }
 0x678   : > { %1744 = vxpose.xlu0.b32.cont [5/16] (narrow) %v1727_v20, 32 }
 0x679   : > { %v1696_v6 = vpop.permute.xlu0 %1695 }
 0x67a   : > { %v1733_v32 = vmul.f32 %v1696_v6, %v1605_v10  ;;  %v1711_v37 = vpop.permute.xlu1 %1710 }
 0x67b   : > { %v1736_v30 = vmul.f32 %v1711_v37, %v1608_v13 }
 0x67c   : > { %1745 = vxpose.xlu0.b32.cont [6/16] (narrow) %v1728_v17, 32 }
 0x67d   : > { %v1706_v59 = vpop.permute.xlu0 %1705 }
 0x67e   : > { %v1735_v27 = vmul.f32 %v1706_v59, %v1607_v16  ;;  %v1721_v53 = vpop.permute.xlu1 %1720 }
 0x67f   : > { %v1738_v7 = vmul.f32 %v1721_v53, %v1610_v25 }
 0x680   : > { %1746 = vxpose.xlu0.b32.cont [7/16] (narrow) %v1729_v58, 32 }
 0x681   : > { %v1716_v12 = vpop.permute.xlu0 %1715 }
 0x682   : > { %v1737_v57 = vmul.f32 %v1716_v12, %v1609_v41 }
 0x684   : > { %1747 = vxpose.xlu0.b32.cont [8/16] (narrow) %v1730_v50, 32 }
 0x688   : > { %1748 = vxpose.xlu0.b32.cont [9/16] (narrow) %v1731_v52, 32 }
 0x68c   : > { %1749 = vxpose.xlu0.b32.cont [10/16] (narrow) %v1732_v63, 32 }
 0x690   : > { %1750 = vxpose.xlu0.b32.cont [11/16] (narrow) %v1733_v32, 32 }
 0x694   : > { %1751 = vxpose.xlu0.b32.cont [12/16] (narrow) %v1734_v0, 32 }
 0x698   : > { %1752 = vxpose.xlu0.b32.cont [13/16] (narrow) %v1735_v27, 32 }
 0x69c   : > { %1753 = vxpose.xlu0.b32.cont [14/16] (narrow) %v1736_v30, 32 }
 0x6a0   : > { %1754 = vxpose.xlu0.b32.cont [15/16] (narrow) %v1737_v57, 32 }
 0x6a4   : > { %1755 = vxpose.xlu0.b32.end [16/16] (narrow) %v1738_v7, 32 }
 0x6e8   : > { %v1756_v45 = vpop.trf.xlu0 }
 0x6e9   : > { %v1773_v11 = vmul.f32 %v1772_v1, %v1756_v45 }
 0x6eb   : > { %v1785_v40 = vadd.f32 %v2011_v56, %v1773_v11 }
 0x6ec   : > { %v1757_v2 = vpop.trf.xlu0 }
 0x6ed   : > { %1789 = vst [vmem:[%s2798_s15] sm:$0xff] %v1785_v40  ;;  %v1774_v51 = vmul.f32 %v1772_v1, %v1757_v2 }
 0x6ef   : > { %v1786_v49 = vadd.f32 %v2012_v33, %v1774_v51 }
 0x6f0   : > { %v1758_v24 = vpop.trf.xlu0 }
 0x6f1   : > { %1790 = vst [vmem:[%s2798_s15 + $0x8] sm:$0xff] %v1786_v49  ;;  %v1775_v47 = vmul.f32 %v1772_v1, %v1758_v24 }
 0x6f3   : > { %v1787_v19 = vadd.f32 %v2015_v46, %v1775_v47 }
 0x6f4   : > { %v1759_v61 = vpop.trf.xlu0 }
 0x6f5   : > { %1791 = vst [vmem:[%s2798_s15 + $0x10] sm:$0xff] %v1787_v19  ;;  %v1776_v29 = vmul.f32 %v1772_v1, %v1759_v61 }
 0x6f7   : > { %v1788_v22 = vadd.f32 %v2016_v55, %v1776_v29 }
 0x6f9   : > { %1792 = vst [vmem:[%s2798_s15 + $0x18] sm:$0xff] %v1788_v22 }
 0x6fa PF: > { %s3402_s20 = sld [smem:[#allocation16_spill]]  ;;  %s3403_s10 = sld [smem:[#allocation15_spill]] }
 0x6fb   : > { %s1808_s21 = sshll.u32 %s2798_s15, 4  ;;  %s3404_s0 = sld [smem:[#allocation25_spill]]  ;;  %s3281_s21 = int_to_ptr.vmem [resolvable:$true] %s1808_s21 }
 0x6fc   : > { %s1794_s9 = scalar_lea.sflag [#allocation11], %s2784_s4  ;;  %s2402_s2 = scalar_lea.vmem %s3281_s21, 512 }
 0x6fd   : > { %p2403_p7 = scmp.ne.s32.totalorder %s3281_s21, %s2402_s2  ;;  %p3406_p3 = scmp.ne.s32.totalorder %s3393_s27, 0 }
 0x6ff   : > { %p2404_p4 = pnand %p2403_p7, %p3406_p3 }
 0x700   : > { %s1980_s24 = sshll.u32 %s3402_s20, 3  ;;  %s2553_s20 = smov [#allocation12]  }
 0x701   : > { %s1805_s19 = sadd.s32 %s3403_s10, %s1980_s24  ;;  %s3405_s7 = smov %s3404_s0 }
 0x702   : > { %s1981_s23 = sshll.u32 %s1805_s19, 7  ;;  %p2405_p8 = pneg %p2404_p4 }
 0x703   : > { %s3286_s18 = scalar_lea.hbm %s3404_s0, %s1981_s23  ;;  %s2406_s10 = sshll.u32 %s2553_s20, 4  ;;  %s2407_s10 = int_to_ptr.vmem [resolvable:$false] %s2406_s10 }
 0x704   : > { %s2408_s15 = scalar_lea.vmem %s2407_s10, 1024  ;;  %p2409_p1 = scmp.lt.s32.totalorder %s3281_s21, %s2407_s10 }
 0x705   : > { %p2410_p5 = scmp.lt.s32.totalorder %s2408_s15, %s2402_s2 }
 0x707   : > { %p2411_p11 = por %p2410_p5, %p2409_p1 }
 0x709   : > { %p2412_p12 = pnand %p2411_p11, %p2405_p8 }
 0x70b   : > { %2415 = shalt.err (!%p2412_p12)
}
 0x70c   : > { %s2416_s24 = scalar_lea.hbm %s3286_s18, 512  ;;  %s2420_s1 = scalar_lea.hbm %s3405_s7, 2048 }
 0x70d   : > { %p2417_p10 = scmp.ne.s32.totalorder %s3286_s18, %s2416_s24  ;;  %p2421_p9 = scmp.lt.u32.totalorder %s3286_s18, %s3405_s7 }
 0x70e   : > { %p2422_p0 = scmp.lt.u32.totalorder %s2420_s1, %s2416_s24  ;;  %p2424_p7 = scmp.lt.u32.totalorder %s2416_s24, %s3286_s18 }
 0x70f   : > { %p2418_p13 = pnand %p2417_p10, %p3406_p3 }
 0x710   : > { %p2423_p6 = por %p2422_p0, %p2421_p9 }
 0x711   : > { %p2419_p2 = pneg %p2418_p13 }
 0x712   : > { %p2425_p4 = por %p2424_p7, %p2423_p6 }
 0x714   : > { %p2426_p8 = pnand %p2425_p4, %p2419_p2 }
 0x716   : > { %2429 = shalt.err (!%p2426_p8)
}
 0x717   : > { %s2554_s2 = smov 128   ;;  %s2555_s20 = smov 256  }
 0x718   : > { %s2556_s10 = smov 8  }
 0x719   : > { %2139 = dma.vmem_to_hbm [thread:$0]  (%p3406_p3), %s3281_s21, 512, %s3286_s18, %s1794_s9, %s2554_s2, %s2555_s20, %s2556_s10  }
 0x71a PF: > { %p2145_p1 = scmp.ge.s32.totalorder %s2540_s14, 2  ;;  %s1823_s15 = sand.u32 1, %s2492_s26  }
 0x71b   : > { %p3407_p5 = scmp.ne.s32.totalorder %s3394_s5, 0  ;;  %s1824_s24 = scalar_lea.sflag [#allocation11], %s1823_s15 }
 0x71d   : > { %p2142_p11 = pnand %p2145_p1, %p3407_p5 }
 0x71f   : > { %2487 = dma.done.wait (!%p2142_p11), %s1824_s24, 512  }
 0x720   : > { %2489 = vsyncadd (!%p2142_p11), %s1824_s24, 4294966784  ;;  %s24_s14 = sadd.s32 1, %s2540_s14   ;;  %s3409_s9 = sld [smem:[#allocation17_spill]] }
 0x721   : > { %p3317_p12 = scmp.ge.s32.totalorder %s24_s14, 10   ;;  %s3410_s5 = sld [smem:[#allocation18_spill]] }
 0x722   : > { %s3411_s4 = sld [smem:[#allocation19_spill]]  ;;  %s3412_s26 = smov %s2508_s30 }
 0x723   : > { %s3413_s27 = smov %s2500_s28  ;;  %s3414_s28 = smov %s2504_s29 }
 0x724   : > { %s3415_s29 = smov %s2715_s11  ;;  %s3416_s30 = smov %s2512_s8 }
 0x725   : > { %s3417_s8 = smov %s2712_s6  ;;  %s3418_s10 = smov %s2532_s12 }
 0x726   : > { %s3419_s0 = smov %s2536_s13  ;;  %s3420_s11 = smov %s3424_s17 }
 0x727   : > { %s3421_s12 = smov %s3410_s5  ;;  %23 = sbr.rel (!%p3317_p12) target bundleno = 18 (0x12), region = 156 }
 0x728   : > { %s3422_s13 = smov %s3411_s4 }
 0x72e   :  { %1829 = vsyncpa [#allocation10], 1 }
 0x72f   :  { %1831 = vsyncpa [#allocation10 + $0x1], 1 }
 0x730   :  { %1832 = vsyncpa [#allocation11], 1 }
 0x731   :  { %1834 = vsyncpa [#allocation11 + $0x1], 1 }

</bundles_post_ra>
